<compile_context>
chip_gen: v7x
topology: tpu7x:2x2x1
jax: 0.10.0
libtpu: 0.0.40
codegen_flags: <defaults>
</compile_context>

<pallas_src>
import functools

import jax
import jax.numpy as jnp
from jax.experimental import pallas as pl
from jax.experimental.pallas import tpu as pltpu


def _vq_kernel(z_ref, et_ref, e_ref, esq_ref,
               q_ref, idx_ref, counts_ref, sse_ref, *,
               total_b, use_rotation):
    f32 = jnp.float32
    z = z_ref[...]                       # (Bt, D), native dtype
    Bt, D = z.shape
    K = e_ref.shape[0]
    zf = z.astype(f32)

    # ---- nearest codeword: argmin_k ||e_k||^2 - 2 z.e_k  (||z||^2 is
    #      row-constant and cannot change the argmin, so it is dropped).
    #      E^T is resident and pre-cast, so this is a plain NN MXU matmul. ----
    et = et_ref[...]                                        # (D, K)
    cross = jnp.dot(z.astype(et.dtype), et,
                    preferred_element_type=f32)             # (Bt, K)
    d = esq_ref[...] - 2.0 * cross                          # argmin only

    iota_k = jax.lax.broadcasted_iota(jnp.int32, (Bt, K), 1)
    min_d = jnp.min(d, axis=1, keepdims=True)
    # first-occurrence argmin (matches torch.argmin tie-breaking)
    idx_col = jnp.min(jnp.where(d <= min_d, iota_k, K), axis=1,
                      keepdims=True)                        # (Bt, 1)
    hit = iota_k == idx_col                                 # (Bt, K) bool

    mm_dtype = e_ref.dtype
    enc_mm = hit.astype(mm_dtype)                           # one-hot, gather dtype
    if jnp.dtype(mm_dtype) == jnp.dtype(f32):
        enc_f32 = enc_mm                                    # no second cast pass
    else:
        enc_f32 = hit.astype(f32)                           # exact ints > 256

    # ---- gather codebook rows with a one-hot matmul (MXU, no dynamic gather)
    quantized = jnp.dot(enc_mm, e_ref[...],
                        preferred_element_type=f32)         # (Bt, D)

    # ---- Householder rotation: R z = z - 2 v (v . z) ----
    if use_rotation:
        zz = jnp.sum(zf * zf, axis=-1, keepdims=True)
        qq = jnp.sum(quantized * quantized, axis=-1, keepdims=True)
        z_n = zf * (1.0 / jnp.maximum(jnp.sqrt(zz), 1e-12))
        q_n = quantized * (1.0 / jnp.maximum(jnp.sqrt(qq), 1e-12))
        v = z_n - q_n
        v_norm = jnp.sqrt(jnp.sum(v * v, axis=-1, keepdims=True))
        is_big = (v_norm > 1e-5).astype(f32)
        v = v * (is_big / (v_norm + 1e-8) + (1.0 - is_big))
        vz = jnp.sum(v * zf, axis=-1, keepdims=True)
        q_out = zf - 2.0 * v * vz
    else:
        q_out = quantized
    q_ref[...] = q_out.astype(q_ref.dtype)

    # ---- per-tile partial statistics (reduced in the wrapper; keeps the
    #      batch grid axis "parallel") ----
    row0 = pl.program_id(0) * Bt
    valid_col = ((jax.lax.broadcasted_iota(jnp.int32, (Bt, 1), 0) + row0)
                 < total_b).astype(f32)                     # masks padded rows
    valid_row = ((jax.lax.broadcasted_iota(jnp.int32, (1, Bt), 1) + row0)
                 < total_b).astype(f32)

    diff = q_out - zf
    per_row_sse = jnp.sum(diff * diff, axis=-1, keepdims=True) * valid_col
    sse_ref[...] = jnp.sum(per_row_sse, axis=0, keepdims=True)[None]  # (1,1,1)

    # one-hot counts on the MXU: (1,Bt) @ (Bt,K) -> (1,K)
    counts = jax.lax.dot_general(valid_row, enc_f32, (((1,), (0,)), ((), ())),
                                 preferred_element_type=f32)
    counts_ref[...] = counts[None]

    # lane-dense indices: idx[b] = sum_k k * enc[b, k] via a tiny MXU
    # contraction -> (1, Bt) row (no sublane->lane relayout).
    iota_row = jax.lax.broadcasted_iota(jnp.int32, (1, K), 1).astype(f32)
    idx_row = jax.lax.dot_general(iota_row, enc_f32, (((1,), (1,)), ((), ())),
                                  preferred_element_type=f32)   # (1, Bt)
    idx_ref[...] = (idx_row[None] + 0.5).astype(jnp.int32)      # exact floor


def vector_quantizer_forward(z_e, embedding, commitment_cost=0.25, *,
                             use_rotation=True, block_b=1024, min_tiles=2,
                             distance_matmul_dtype=None,
                             vmem_budget_bytes=None):
    """z_e: [B, D], embedding: [K, D]. Returns (q_out, loss, perplexity, idx)."""
    B, D = z_e.shape
    K, D2 = embedding.shape
    assert D == D2, "embedding_dim mismatch"
    assert K < (1 << 24), "lane-dense f32 index trick requires K < 2**24"

    z_dtype = jnp.dtype(z_e.dtype)
    e_dtype = jnp.dtype(embedding.dtype)
    # optional lower-precision distance matmul (e.g. bf16 on v5e); the
    # compare/argmin, gather and rotation math stay in f32.
    dist_dtype = (jnp.dtype(distance_matmul_dtype)
                  if distance_matmul_dtype is not None
                  else jnp.promote_types(z_dtype, e_dtype))

    # ---- per-generation VMEM budget -> batch tile Bt ----
    if vmem_budget_bytes is None:
        try:
            cap = int(pltpu.get_tpu_info().vmem_capacity_bytes)
        except Exception:
            cap = 64 * 1024 * 1024            # conservative: v7x per-TC VMEM
        vmem_budget_bytes = int(cap * 0.85)
    vmem_budget_bytes = int(min(int(vmem_budget_bytes), 120 * 1024 * 1024))

    resident = K * D * (e_dtype.itemsize + dist_dtype.itemsize) + 4 * K
    fixed = resident + 2 * (K * 4 + 8) + (256 << 10)     # counts/sse + slack
    per_row = (2 * 2 * D * z_dtype.itemsize              # z in + q out, x2 bufs
               + 7 * 4 * K                                # (Bt,K) f32/i32 temps
               + 10 * 4 * D                               # (Bt,D) f32 temps
               + 2 * 4)                                   # idx row, x2 bufs
    bt_cap = max(8, (vmem_budget_bytes - fixed) // per_row)

    bt = max(1, min(int(block_b), int(bt_cap), B))
    if B > 8 and min_tiles > 1:
        bt = min(bt, -(-B // int(min_tiles)))             # >= min_tiles tiles
    if bt >= 128:
        bt = (bt // 128) * 128                            # lane-dense idx rows
    else:
        bt = max(8, ((bt + 7) // 8) * 8)                  # sublane aligned
    # prefer a Bt dividing B (skips the pad + slice HBM round trip) when the
    # nearest such tile is not much smaller.
    if bt < B and B % bt != 0:
        step = 128 if bt >= 128 else 8
        c = bt - step
        while c >= max(step, (3 * bt) // 4):
            if B % c == 0:
                bt = c
                break
            c -= step
    Bt = int(bt)
    T = -(-B // Bt)
    B_pad = T * Bt
    z_in = z_e if B_pad == B else jnp.pad(z_e, ((0, B_pad - B), (0, 0)))

    # grid-invariant resident operands (computed once in the wrapper)
    e_t = embedding.T.astype(dist_dtype)                  # (D, K) NN operand
    e_sq = jnp.sum(jnp.square(embedding.astype(jnp.float32)),
                   axis=1)[None, :]                       # (1, K) f32

    kernel = functools.partial(_vq_kernel, total_b=B, use_rotation=use_rotation)

    out_shape = (
        jax.ShapeDtypeStruct((B_pad, D), z_e.dtype),      # rotated q
        jax.ShapeDtypeStruct((T, 1, Bt), jnp.int32),      # indices (lane-dense)
        jax.ShapeDtypeStruct((T, 1, K), jnp.float32),     # per-tile one-hot counts
        jax.ShapeDtypeStruct((T, 1, 1), jnp.float32),     # per-tile sum sq. error
    )
    out_specs = (
        pl.BlockSpec((Bt, D), lambda i: (i, 0)),
        pl.BlockSpec((1, 1, Bt), lambda i: (i, 0, 0)),
        pl.BlockSpec((1, 1, K), lambda i: (i, 0, 0)),
        pl.BlockSpec((1, 1, 1), lambda i: (i, 0, 0)),
    )

    def make_call(single_buffer_resident):
        res_kw = ({"pipeline_mode": pl.Buffered(1)}
                  if single_buffer_resident else {})
        in_specs = [
            pl.BlockSpec((Bt, D), lambda i: (i, 0)),               # z tile
            pl.BlockSpec((D, K), lambda i: (0, 0), **res_kw),      # E^T resident
            pl.BlockSpec((K, D), lambda i: (0, 0), **res_kw),      # E resident
            pl.BlockSpec((1, K), lambda i: (0, 0), **res_kw),      # ||e||^2
        ]
        return pl.pallas_call(
            kernel,
            grid=(T,),
            in_specs=in_specs,
            out_specs=out_specs,
            out_shape=out_shape,
            compiler_params=pltpu.CompilerParams(
                dimension_semantics=("parallel",),
                vmem_limit_bytes=int(vmem_budget_bytes)),
        )

    try:
        q_pad, idx_t, counts_t, sse_t = make_call(True)(z_in, e_t, embedding,
                                                        e_sq)
    except Exception:
        # TODO(synk): pipeline_mode=pl.Buffered(1) not supported by this jax;
        # fall back to default (double-buffered) resident operands.
        q_pad, idx_t, counts_t, sse_t = make_call(False)(z_in, e_t, embedding,
                                                         e_sq)

    # Final (tiny) reductions in the wrapper, using the *global* batch size.
    q = q_pad if B_pad == B else q_pad[:B]
    idx = idx_t.reshape(B_pad)[:B]
    counts = jnp.sum(counts_t.reshape(T, K), axis=0)
    sse = jnp.sum(sse_t)
    mse = sse / float(B * D)
    loss = (1.0 + commitment_cost) * mse
    avg_probs = counts / float(B)
    perplexity = jnp.exp(-jnp.sum(avg_probs * jnp.log(avg_probs + 1e-10)))
    return q, loss, perplexity, idx


def _reference(z, E, commitment_cost=0.25):
    """Pure-JAX reference mirroring the PyTorch forward (eval mode)."""
    hp = jax.lax.Precision.HIGHEST
    d = (jnp.sum(z * z, 1, keepdims=True) + jnp.sum(E * E, 1)
         - 2.0 * jnp.dot(z, E.T, precision=hp))
    idx = jnp.argmin(d, axis=1)
    enc = jax.nn.one_hot(idx, E.shape[0], dtype=jnp.float32)
    quantized = E[idx]
    z_n = z / jnp.maximum(jnp.linalg.norm(z, axis=-1, keepdims=True), 1e-12)
    q_n = quantized / jnp.maximum(
        jnp.linalg.norm(quantized, axis=-1, keepdims=True), 1e-12)
    v = z_n - q_n
    v_norm = jnp.linalg.norm(v, axis=-1, keepdims=True)
    mask = (v_norm > 1e-5).astype(jnp.float32)
    v = mask * v / (v_norm + 1e-8) + (1 - mask) * v
    I = jnp.eye(z.shape[1], dtype=jnp.float32)
    R = I - 2.0 * v[:, :, None] * v[:, None, :]
    q_out = jnp.einsum('bij,bj->bi', R, z, precision=hp)
    mse = jnp.mean((q_out - z) ** 2)
    loss = (1.0 + commitment_cost) * mse
    avg = jnp.mean(enc, axis=0)
    perp = jnp.exp(-jnp.sum(avg * jnp.log(avg + 1e-10)))
    return q_out, loss, perp, idx


if __name__ == "__main__":
    num_embeddings = 64
    embedding_dim = 32
    batch = 40                 # deliberately not a multiple of the batch tile
    commitment_cost = 0.25

    key = jax.random.PRNGKey(0)
    k_emb, k_z = jax.random.split(key)
    # deterministic init, matching uniform_(-1/K, 1/K)
    embedding = jax.random.uniform(
        k_emb, (num_embeddings, embedding_dim), jnp.float32,
        minval=-1.0 / num_embeddings, maxval=1.0 / num_embeddings)
    z_e = jax.random.normal(k_z, (batch, embedding_dim), jnp.float32)

    q_r, loss_r, perp_r, idx_r = _reference(z_e, embedding, commitment_cost)

    # (a) default path: VMEM-budget-derived tile, >=2 tiles for megacore
    # (b) forced small tile: exercises multi-tile + zero-padded / masked rows
    for kwargs in ({}, {"block_b": 16}):
        q, loss, perp, idx = vector_quantizer_forward(
            z_e, embedding, commitment_cost, **kwargs)
        jax.block_until_ready((q, loss, perp, idx))
        assert q.shape == z_e.shape and idx.shape == (batch,)
        assert jnp.allclose(q, q_r, atol=1e-4, rtol=1e-4), "q_out mismatch"
        assert jnp.allclose(loss, loss_r, atol=1e-6, rtol=1e-4), "loss mismatch"
        assert jnp.allclose(perp, perp_r, atol=1e-4, rtol=1e-4), \
            "perplexity mismatch"
        assert jnp.array_equal(idx, idx_r.astype(jnp.int32)), "indices mismatch"

    print("KERNEL_OK")
</pallas_src>

<mosaic_0001>
module attributes {stable_mosaic.version = 11 : i64} {
  func.func @_vq_kernel(%arg0: i32, %arg1: memref<24x32xf32, #tpu.memory_space<vmem>>, %arg2: memref<32x64xf32, #tpu.memory_space<vmem>>, %arg3: memref<64x32xf32, #tpu.memory_space<vmem>>, %arg4: memref<1x64xf32, #tpu.memory_space<vmem>>, %arg5: memref<24x32xf32, #tpu.memory_space<vmem>>, %arg6: memref<1x1x24xi32, #tpu.memory_space<vmem>>, %arg7: memref<1x1x64xf32, #tpu.memory_space<vmem>>, %arg8: memref<1x1x1xf32, #tpu.memory_space<vmem>>) attributes {dimension_semantics = [#tpu.dimension_semantics<parallel>], iteration_bounds = array<i64: 2>, scalar_prefetch = 0 : i64, scratch_operands = 0 : i64, tpu.core_type = #tpu.core_type<tc>, window_params = [{transform_indices = @transform_0, window_bounds = array<i64: 24, 32>}, {pipeline_mode = #tpu.pipeline_mode<synchronous>, transform_indices = @transform_1, window_bounds = array<i64: 32, 64>}, {pipeline_mode = #tpu.pipeline_mode<synchronous>, transform_indices = @transform_2, window_bounds = array<i64: 64, 32>}, {pipeline_mode = #tpu.pipeline_mode<synchronous>, transform_indices = @transform_3, window_bounds = array<i64: 1, 64>}, {transform_indices = @transform_4, window_bounds = array<i64: 24, 32>}, {transform_indices = @transform_5, window_bounds = array<i64: 1, 1, 24>}, {transform_indices = @transform_6, window_bounds = array<i64: 1, 1, 64>}, {transform_indices = @transform_7, window_bounds = array<i64: 1, 1, 1>}]} {
    %c0 = arith.constant 0 : index
    %c0_0 = arith.constant 0 : index
    %0 = vector.load %arg1[%c0, %c0_0] : memref<24x32xf32, #tpu.memory_space<vmem>>, vector<24x32xf32>
    %c0_1 = arith.constant 0 : index
    %c0_2 = arith.constant 0 : index
    %1 = vector.load %arg2[%c0_1, %c0_2] : memref<32x64xf32, #tpu.memory_space<vmem>>, vector<32x64xf32>
    %cst = arith.constant dense<0.000000e+00> : vector<24x64xf32>
    %2 = tpu.matmul %0, %1, %cst {dimension_numbers = #tpu.dot_dimension_numbers<[1], [0], [0], [1], [0, 0, 1, 1], [], []>} : vector<24x32xf32>, vector<32x64xf32>, vector<24x64xf32> -> vector<24x64xf32>
    %c0_3 = arith.constant 0 : index
    %c0_4 = arith.constant 0 : index
    %3 = vector.load %arg4[%c0_3, %c0_4] : memref<1x64xf32, #tpu.memory_space<vmem>>, vector<1x64xf32>
    %cst_5 = arith.constant 2.000000e+00 : f32
    %4 = vector.broadcast %cst_5 : f32 to vector<24x64xf32>
    %5 = arith.mulf %4, %2 : vector<24x64xf32>
    %6 = vector.broadcast %3 : vector<1x64xf32> to vector<24x64xf32>
    %7 = arith.subf %6, %5 : vector<24x64xf32>
    %8 = tpu.iota {dimensions = array<i32: 1>} : vector<24x64xi32>
    %cst_6 = arith.constant dense<0x7F800000> : vector<24xf32>
    %9 = vector.multi_reduction <minimumf>, %7, %cst_6 [1] : vector<24x64xf32> to vector<24xf32>
    %10 = vector.shape_cast %9 : vector<24xf32> to vector<24x1xf32>
    %11 = vector.broadcast %10 : vector<24x1xf32> to vector<24x64xf32>
    %12 = arith.cmpf ole, %7, %11 : vector<24x64xf32>
    %c64_i32 = arith.constant 64 : i32
    %13 = vector.broadcast %c64_i32 : i32 to vector<24x64xi32>
    %14 = arith.select %12, %8, %13 : vector<24x64xi1>, vector<24x64xi32>
    %cst_7 = arith.constant dense<2147483647> : vector<24xi32>
    %15 = vector.multi_reduction <minsi>, %14, %cst_7 [1] : vector<24x64xi32> to vector<24xi32>
    %16 = vector.shape_cast %15 : vector<24xi32> to vector<24x1xi32>
    %17 = vector.broadcast %16 : vector<24x1xi32> to vector<24x64xi32>
    %18 = arith.cmpi eq, %8, %17 : vector<24x64xi32>
    %19 = arith.extui %18 : vector<24x64xi1> to vector<24x64xi32>
    %20 = arith.sitofp %19 : vector<24x64xi32> to vector<24x64xf32>
    %c0_8 = arith.constant 0 : index
    %c0_9 = arith.constant 0 : index
    %21 = vector.load %arg3[%c0_8, %c0_9] : memref<64x32xf32, #tpu.memory_space<vmem>>, vector<64x32xf32>
    %cst_10 = arith.constant dense<0.000000e+00> : vector<24x32xf32>
    %22 = tpu.matmul %20, %21, %cst_10 {dimension_numbers = #tpu.dot_dimension_numbers<[1], [0], [0], [1], [0, 0, 1, 1], [], []>} : vector<24x64xf32>, vector<64x32xf32>, vector<24x32xf32> -> vector<24x32xf32>
    %23 = arith.mulf %0, %0 : vector<24x32xf32>
    %cst_11 = arith.constant dense<0.000000e+00> : vector<24xf32>
    %24 = vector.multi_reduction <add>, %23, %cst_11 [1] : vector<24x32xf32> to vector<24xf32>
    %25 = vector.shape_cast %24 : vector<24xf32> to vector<24x1xf32>
    %26 = arith.mulf %22, %22 : vector<24x32xf32>
    %cst_12 = arith.constant dense<0.000000e+00> : vector<24xf32>
    %27 = vector.multi_reduction <add>, %26, %cst_12 [1] : vector<24x32xf32> to vector<24xf32>
    %28 = vector.shape_cast %27 : vector<24xf32> to vector<24x1xf32>
    %29 = math.sqrt %25 : vector<24x1xf32>
    %cst_13 = arith.constant 9.99999996E-13 : f32
    %30 = vector.broadcast %cst_13 : f32 to vector<24x1xf32>
    %31 = arith.maximumf %29, %30 : vector<24x1xf32>
    %cst_14 = arith.constant 1.000000e+00 : f32
    %32 = vector.broadcast %cst_14 : f32 to vector<24x1xf32>
    %33 = arith.divf %32, %31 : vector<24x1xf32>
    %34 = vector.broadcast %33 : vector<24x1xf32> to vector<24x32xf32>
    %35 = arith.mulf %0, %34 : vector<24x32xf32>
    %36 = math.sqrt %28 : vector<24x1xf32>
    %cst_15 = arith.constant 9.99999996E-13 : f32
    %37 = vector.broadcast %cst_15 : f32 to vector<24x1xf32>
    %38 = arith.maximumf %36, %37 : vector<24x1xf32>
    %cst_16 = arith.constant 1.000000e+00 : f32
    %39 = vector.broadcast %cst_16 : f32 to vector<24x1xf32>
    %40 = arith.divf %39, %38 : vector<24x1xf32>
    %41 = vector.broadcast %40 : vector<24x1xf32> to vector<24x32xf32>
    %42 = arith.mulf %22, %41 : vector<24x32xf32>
    %43 = arith.subf %35, %42 : vector<24x32xf32>
    %44 = arith.mulf %43, %43 : vector<24x32xf32>
    %cst_17 = arith.constant dense<0.000000e+00> : vector<24xf32>
    %45 = vector.multi_reduction <add>, %44, %cst_17 [1] : vector<24x32xf32> to vector<24xf32>
    %46 = vector.shape_cast %45 : vector<24xf32> to vector<24x1xf32>
    %47 = math.sqrt %46 : vector<24x1xf32>
    %cst_18 = arith.constant 9.99999974E-6 : f32
    %48 = vector.broadcast %cst_18 : f32 to vector<24x1xf32>
    %49 = arith.cmpf ogt, %47, %48 : vector<24x1xf32>
    %50 = arith.extui %49 : vector<24x1xi1> to vector<24x1xi32>
    %51 = arith.sitofp %50 : vector<24x1xi32> to vector<24x1xf32>
    %cst_19 = arith.constant 9.99999993E-9 : f32
    %52 = vector.broadcast %cst_19 : f32 to vector<24x1xf32>
    %53 = arith.addf %47, %52 : vector<24x1xf32>
    %54 = arith.divf %51, %53 : vector<24x1xf32>
    %cst_20 = arith.constant 1.000000e+00 : f32
    %55 = vector.broadcast %cst_20 : f32 to vector<24x1xf32>
    %56 = arith.subf %55, %51 : vector<24x1xf32>
    %57 = arith.addf %54, %56 : vector<24x1xf32>
    %58 = vector.broadcast %57 : vector<24x1xf32> to vector<24x32xf32>
    %59 = arith.mulf %43, %58 : vector<24x32xf32>
    %60 = arith.mulf %59, %0 : vector<24x32xf32>
    %cst_21 = arith.constant dense<0.000000e+00> : vector<24xf32>
    %61 = vector.multi_reduction <add>, %60, %cst_21 [1] : vector<24x32xf32> to vector<24xf32>
    %62 = vector.shape_cast %61 : vector<24xf32> to vector<24x1xf32>
    %cst_22 = arith.constant 2.000000e+00 : f32
    %63 = vector.broadcast %cst_22 : f32 to vector<24x32xf32>
    %64 = arith.mulf %63, %59 : vector<24x32xf32>
    %65 = vector.broadcast %62 : vector<24x1xf32> to vector<24x32xf32>
    %66 = arith.mulf %64, %65 : vector<24x32xf32>
    %67 = arith.subf %0, %66 : vector<24x32xf32>
    %c0_23 = arith.constant 0 : index
    %c0_24 = arith.constant 0 : index
    %68 = vector.load %arg5[%c0_23, %c0_24] : memref<24x32xf32, #tpu.memory_space<vmem>>, vector<24x32xf32>
    tpu.vector_store %arg5[%c0_23, %c0_24], %67 {strides = array<i32>} : memref<24x32xf32, #tpu.memory_space<vmem>>, vector<24x32xf32>,
    %c24_i32 = arith.constant 24 : i32
    %69 = arith.muli %arg0, %c24_i32 : i32
    %70 = tpu.iota {dimensions = array<i32: 0>} : vector<24x1xi32>
    %71 = vector.broadcast %69 : i32 to vector<24x1xi32>
    %72 = arith.addi %70, %71 : vector<24x1xi32>
    %c40_i32 = arith.constant 40 : i32
    %73 = vector.broadcast %c40_i32 : i32 to vector<24x1xi32>
    %74 = arith.cmpi slt, %72, %73 : vector<24x1xi32>
    %75 = arith.extui %74 : vector<24x1xi1> to vector<24x1xi32>
    %76 = arith.sitofp %75 : vector<24x1xi32> to vector<24x1xf32>
    %77 = tpu.iota {dimensions = array<i32: 1>} : vector<1x24xi32>
    %78 = vector.broadcast %69 : i32 to vector<1x24xi32>
    %79 = arith.addi %77, %78 : vector<1x24xi32>
    %c40_i32_25 = arith.constant 40 : i32
    %80 = vector.broadcast %c40_i32_25 : i32 to vector<1x24xi32>
    %81 = arith.cmpi slt, %79, %80 : vector<1x24xi32>
    %82 = arith.extui %81 : vector<1x24xi1> to vector<1x24xi32>
    %83 = arith.sitofp %82 : vector<1x24xi32> to vector<1x24xf32>
    %84 = arith.subf %67, %0 : vector<24x32xf32>
    %85 = arith.mulf %84, %84 : vector<24x32xf32>
    %cst_26 = arith.constant dense<0.000000e+00> : vector<24xf32>
    %86 = vector.multi_reduction <add>, %85, %cst_26 [1] : vector<24x32xf32> to vector<24xf32>
    %87 = vector.shape_cast %86 : vector<24xf32> to vector<24x1xf32>
    %88 = arith.mulf %87, %76 : vector<24x1xf32>
    %cst_27 = arith.constant dense<0.000000e+00> : vector<1xf32>
    %89 = vector.multi_reduction <add>, %88, %cst_27 [0] : vector<24x1xf32> to vector<1xf32>
    %90 = vector.shape_cast %89 : vector<1xf32> to vector<1x1xf32>
    %91 = vector.shape_cast %90 : vector<1x1xf32> to vector<1x1x1xf32>
    %c0_28 = arith.constant 0 : index
    %c0_29 = arith.constant 0 : index
    %c0_30 = arith.constant 0 : index
    %92 = vector.load %arg8[%c0_28, %c0_29, %c0_30] : memref<1x1x1xf32, #tpu.memory_space<vmem>>, vector<1x1x1xf32>
    tpu.vector_store %arg8[%c0_28, %c0_29, %c0_30], %91 {strides = array<i32>} : memref<1x1x1xf32, #tpu.memory_space<vmem>>, vector<1x1x1xf32>,
    %cst_31 = arith.constant dense<0.000000e+00> : vector<1x64xf32>
    %93 = tpu.matmul %83, %20, %cst_31 {dimension_numbers = #tpu.dot_dimension_numbers<[1], [0], [0], [1], [0, 0, 1, 1], [], []>} : vector<1x24xf32>, vector<24x64xf32>, vector<1x64xf32> -> vector<1x64xf32>
    %94 = vector.shape_cast %93 : vector<1x64xf32> to vector<1x1x64xf32>
    %c0_32 = arith.constant 0 : index
    %c0_33 = arith.constant 0 : index
    %c0_34 = arith.constant 0 : index
    %95 = vector.load %arg7[%c0_32, %c0_33, %c0_34] : memref<1x1x64xf32, #tpu.memory_space<vmem>>, vector<1x1x64xf32>
    tpu.vector_store %arg7[%c0_32, %c0_33, %c0_34], %94 {strides = array<i32>} : memref<1x1x64xf32, #tpu.memory_space<vmem>>, vector<1x1x64xf32>,
    %96 = tpu.iota {dimensions = array<i32: 1>} : vector<1x64xi32>
    %97 = arith.sitofp %96 : vector<1x64xi32> to vector<1x64xf32>
    %cst_35 = arith.constant dense<0.000000e+00> : vector<1x24xf32>
    %98 = tpu.matmul %97, %20, %cst_35 {dimension_numbers = #tpu.dot_dimension_numbers<[1], [1], [0], [0], [0, 0, 1, 0], [], []>} : vector<1x64xf32>, vector<24x64xf32>, vector<1x24xf32> -> vector<1x24xf32>
    %99 = vector.shape_cast %98 : vector<1x24xf32> to vector<1x1x24xf32>
    %cst_36 = arith.constant 5.000000e-01 : f32
    %100 = vector.broadcast %cst_36 : f32 to vector<1x1x24xf32>
    %101 = arith.addf %99, %100 : vector<1x1x24xf32>
    %102 = arith.fptosi %101 : vector<1x1x24xf32> to vector<1x1x24xi32>
    %c0_37 = arith.constant 0 : index
    %c0_38 = arith.constant 0 : index
    %c0_39 = arith.constant 0 : index
    %103 = vector.load %arg6[%c0_37, %c0_38, %c0_39] : memref<1x1x24xi32, #tpu.memory_space<vmem>>, vector<1x1x24xi32>
    tpu.vector_store %arg6[%c0_37, %c0_38, %c0_39], %102 {strides = array<i32>} : memref<1x1x24xi32, #tpu.memory_space<vmem>>, vector<1x1x24xi32>,
    return
  }
  func.func @transform_0(%arg0: i32) -> (i32, i32) {
    %c0_i32 = arith.constant 0 : i32
    %c0_i32_0 = arith.constant 0 : i32
    return %arg0, %c0_i32 : i32, i32
  }
  func.func @transform_1(%arg0: i32) -> (i32, i32) {
    %c0_i32 = arith.constant 0 : i32
    %c0_i32_0 = arith.constant 0 : i32
    %c0_i32_1 = arith.constant 0 : i32
    return %c0_i32, %c0_i32_0 : i32, i32
  }
  func.func @transform_2(%arg0: i32) -> (i32, i32) {
    %c0_i32 = arith.constant 0 : i32
    %c0_i32_0 = arith.constant 0 : i32
    %c0_i32_1 = arith.constant 0 : i32
    return %c0_i32, %c0_i32_0 : i32, i32
  }
  func.func @transform_3(%arg0: i32) -> (i32, i32) {
    %c0_i32 = arith.constant 0 : i32
    %c0_i32_0 = arith.constant 0 : i32
    %c0_i32_1 = arith.constant 0 : i32
    return %c0_i32, %c0_i32_0 : i32, i32
  }
  func.func @transform_4(%arg0: i32) -> (i32, i32) {
    %c0_i32 = arith.constant 0 : i32
    %c0_i32_0 = arith.constant 0 : i32
    return %arg0, %c0_i32 : i32, i32
  }
  func.func @transform_5(%arg0: i32) -> (i32, i32, i32) {
    %c0_i32 = arith.constant 0 : i32
    %c0_i32_0 = arith.constant 0 : i32
    %c0_i32_1 = arith.constant 0 : i32
    return %arg0, %c0_i32, %c0_i32_0 : i32, i32, i32
  }
  func.func @transform_6(%arg0: i32) -> (i32, i32, i32) {
    %c0_i32 = arith.constant 0 : i32
    %c0_i32_0 = arith.constant 0 : i32
    %c0_i32_1 = arith.constant 0 : i32
    return %arg0, %c0_i32, %c0_i32_0 : i32, i32, i32
  }
  func.func @transform_7(%arg0: i32) -> (i32, i32, i32) {
    %c0_i32 = arith.constant 0 : i32
    %c0_i32_0 = arith.constant 0 : i32
    %c0_i32_1 = arith.constant 0 : i32
    return %arg0, %c0_i32, %c0_i32_0 : i32, i32, i32
  }
}

module attributes {stable_mosaic.version = 11 : i64} {
  func.func @_vq_kernel(%arg0: i32, %arg1: memref<24x32xf32, #tpu.memory_space<vmem>>, %arg2: memref<32x64xf32, #tpu.memory_space<vmem>>, %arg3: memref<64x32xf32, #tpu.memory_space<vmem>>, %arg4: memref<1x64xf32, #tpu.memory_space<vmem>>, %arg5: memref<24x32xf32, #tpu.memory_space<vmem>>, %arg6: memref<1x1x24xi32, #tpu.memory_space<vmem>>, %arg7: memref<1x1x64xf32, #tpu.memory_space<vmem>>, %arg8: memref<1x1x1xf32, #tpu.memory_space<vmem>>) attributes {dimension_semantics = [#tpu.dimension_semantics<parallel>], iteration_bounds = array<i64: 2>, scalar_prefetch = 0 : i64, scratch_operands = 0 : i64, tpu.core_type = #tpu.core_type<tc>, window_params = [{transform_indices = @transform_0, window_bounds = array<i64: 24, 32>}, {pipeline_mode = #tpu.pipeline_mode<synchronous>, transform_indices = @transform_1, window_bounds = array<i64: 32, 64>}, {pipeline_mode = #tpu.pipeline_mode<synchronous>, transform_indices = @transform_2, window_bounds = array<i64: 64, 32>}, {pipeline_mode = #tpu.pipeline_mode<synchronous>, transform_indices = @transform_3, window_bounds = array<i64: 1, 64>}, {transform_indices = @transform_4, window_bounds = array<i64: 24, 32>}, {transform_indices = @transform_5, window_bounds = array<i64: 1, 1, 24>}, {transform_indices = @transform_6, window_bounds = array<i64: 1, 1, 64>}, {transform_indices = @transform_7, window_bounds = array<i64: 1, 1, 1>}]} {
    %c0 = arith.constant 0 : index
    %c0_0 = arith.constant 0 : index
    %0 = vector.load %arg1[%c0, %c0_0] : memref<24x32xf32, #tpu.memory_space<vmem>>, vector<24x32xf32>
    %c0_1 = arith.constant 0 : index
    %c0_2 = arith.constant 0 : index
    %1 = vector.load %arg2[%c0_1, %c0_2] : memref<32x64xf32, #tpu.memory_space<vmem>>, vector<32x64xf32>
    %cst = arith.constant dense<0.000000e+00> : vector<24x64xf32>
    %2 = tpu.matmul %0, %1, %cst {dimension_numbers = #tpu.dot_dimension_numbers<[1], [0], [0], [1], [0, 0, 1, 1], [], []>} : vector<24x32xf32>, vector<32x64xf32>, vector<24x64xf32> -> vector<24x64xf32>
    %c0_3 = arith.constant 0 : index
    %c0_4 = arith.constant 0 : index
    %3 = vector.load %arg4[%c0_3, %c0_4] : memref<1x64xf32, #tpu.memory_space<vmem>>, vector<1x64xf32>
    %cst_5 = arith.constant 2.000000e+00 : f32
    %4 = vector.broadcast %cst_5 : f32 to vector<24x64xf32>
    %5 = arith.mulf %4, %2 : vector<24x64xf32>
    %6 = vector.broadcast %3 : vector<1x64xf32> to vector<24x64xf32>
    %7 = arith.subf %6, %5 : vector<24x64xf32>
    %8 = tpu.iota {dimensions = array<i32: 1>} : vector<24x64xi32>
    %cst_6 = arith.constant dense<0x7F800000> : vector<24xf32>
    %9 = vector.multi_reduction <minimumf>, %7, %cst_6 [1] : vector<24x64xf32> to vector<24xf32>
    %10 = vector.shape_cast %9 : vector<24xf32> to vector<24x1xf32>
    %11 = vector.broadcast %10 : vector<24x1xf32> to vector<24x64xf32>
    %12 = arith.cmpf ole, %7, %11 : vector<24x64xf32>
    %c64_i32 = arith.constant 64 : i32
    %13 = vector.broadcast %c64_i32 : i32 to vector<24x64xi32>
    %14 = arith.select %12, %8, %13 : vector<24x64xi1>, vector<24x64xi32>
    %cst_7 = arith.constant dense<2147483647> : vector<24xi32>
    %15 = vector.multi_reduction <minsi>, %14, %cst_7 [1] : vector<24x64xi32> to vector<24xi32>
    %16 = vector.shape_cast %15 : vector<24xi32> to vector<24x1xi32>
    %17 = vector.broadcast %16 : vector<24x1xi32> to vector<24x64xi32>
    %18 = arith.cmpi eq, %8, %17 : vector<24x64xi32>
    %19 = arith.extui %18 : vector<24x64xi1> to vector<24x64xi32>
    %20 = arith.sitofp %19 : vector<24x64xi32> to vector<24x64xf32>
    %c0_8 = arith.constant 0 : index
    %c0_9 = arith.constant 0 : index
    %21 = vector.load %arg3[%c0_8, %c0_9] : memref<64x32xf32, #tpu.memory_space<vmem>>, vector<64x32xf32>
    %cst_10 = arith.constant dense<0.000000e+00> : vector<24x32xf32>
    %22 = tpu.matmul %20, %21, %cst_10 {dimension_numbers = #tpu.dot_dimension_numbers<[1], [0], [0], [1], [0, 0, 1, 1], [], []>} : vector<24x64xf32>, vector<64x32xf32>, vector<24x32xf32> -> vector<24x32xf32>
    %23 = arith.mulf %0, %0 : vector<24x32xf32>
    %cst_11 = arith.constant dense<0.000000e+00> : vector<24xf32>
    %24 = vector.multi_reduction <add>, %23, %cst_11 [1] : vector<24x32xf32> to vector<24xf32>
    %25 = vector.shape_cast %24 : vector<24xf32> to vector<24x1xf32>
    %26 = arith.mulf %22, %22 : vector<24x32xf32>
    %cst_12 = arith.constant dense<0.000000e+00> : vector<24xf32>
    %27 = vector.multi_reduction <add>, %26, %cst_12 [1] : vector<24x32xf32> to vector<24xf32>
    %28 = vector.shape_cast %27 : vector<24xf32> to vector<24x1xf32>
    %29 = math.sqrt %25 : vector<24x1xf32>
    %cst_13 = arith.constant 9.99999996E-13 : f32
    %30 = vector.broadcast %cst_13 : f32 to vector<24x1xf32>
    %31 = arith.maximumf %29, %30 : vector<24x1xf32>
    %cst_14 = arith.constant 1.000000e+00 : f32
    %32 = vector.broadcast %cst_14 : f32 to vector<24x1xf32>
    %33 = arith.divf %32, %31 : vector<24x1xf32>
    %34 = vector.broadcast %33 : vector<24x1xf32> to vector<24x32xf32>
    %35 = arith.mulf %0, %34 : vector<24x32xf32>
    %36 = math.sqrt %28 : vector<24x1xf32>
    %cst_15 = arith.constant 9.99999996E-13 : f32
    %37 = vector.broadcast %cst_15 : f32 to vector<24x1xf32>
    %38 = arith.maximumf %36, %37 : vector<24x1xf32>
    %cst_16 = arith.constant 1.000000e+00 : f32
    %39 = vector.broadcast %cst_16 : f32 to vector<24x1xf32>
    %40 = arith.divf %39, %38 : vector<24x1xf32>
    %41 = vector.broadcast %40 : vector<24x1xf32> to vector<24x32xf32>
    %42 = arith.mulf %22, %41 : vector<24x32xf32>
    %43 = arith.subf %35, %42 : vector<24x32xf32>
    %44 = arith.mulf %43, %43 : vector<24x32xf32>
    %cst_17 = arith.constant dense<0.000000e+00> : vector<24xf32>
    %45 = vector.multi_reduction <add>, %44, %cst_17 [1] : vector<24x32xf32> to vector<24xf32>
    %46 = vector.shape_cast %45 : vector<24xf32> to vector<24x1xf32>
    %47 = math.sqrt %46 : vector<24x1xf32>
    %cst_18 = arith.constant 9.99999974E-6 : f32
    %48 = vector.broadcast %cst_18 : f32 to vector<24x1xf32>
    %49 = arith.cmpf ogt, %47, %48 : vector<24x1xf32>
    %50 = arith.extui %49 : vector<24x1xi1> to vector<24x1xi32>
    %51 = arith.sitofp %50 : vector<24x1xi32> to vector<24x1xf32>
    %cst_19 = arith.constant 9.99999993E-9 : f32
    %52 = vector.broadcast %cst_19 : f32 to vector<24x1xf32>
    %53 = arith.addf %47, %52 : vector<24x1xf32>
    %54 = arith.divf %51, %53 : vector<24x1xf32>
    %cst_20 = arith.constant 1.000000e+00 : f32
    %55 = vector.broadcast %cst_20 : f32 to vector<24x1xf32>
    %56 = arith.subf %55, %51 : vector<24x1xf32>
    %57 = arith.addf %54, %56 : vector<24x1xf32>
    %58 = vector.broadcast %57 : vector<24x1xf32> to vector<24x32xf32>
    %59 = arith.mulf %43, %58 : vector<24x32xf32>
    %60 = arith.mulf %59, %0 : vector<24x32xf32>
    %cst_21 = arith.constant dense<0.000000e+00> : vector<24xf32>
    %61 = vector.multi_reduction <add>, %60, %cst_21 [1] : vector<24x32xf32> to vector<24xf32>
    %62 = vector.shape_cast %61 : vector<24xf32> to vector<24x1xf32>
    %cst_22 = arith.constant 2.000000e+00 : f32
    %63 = vector.broadcast %cst_22 : f32 to vector<24x32xf32>
    %64 = arith.mulf %63, %59 : vector<24x32xf32>
    %65 = vector.broadcast %62 : vector<24x1xf32> to vector<24x32xf32>
    %66 = arith.mulf %64, %65 : vector<24x32xf32>
    %67 = arith.subf %0, %66 : vector<24x32xf32>
    %c0_23 = arith.constant 0 : index
    %c0_24 = arith.constant 0 : index
    %68 = vector.load %arg5[%c0_23, %c0_24] : memref<24x32xf32, #tpu.memory_space<vmem>>, vector<24x32xf32>
    tpu.vector_store %arg5[%c0_23, %c0_24], %67 {strides = array<i32>} : memref<24x32xf32, #tpu.memory_space<vmem>>, vector<24x32xf32>,
    %c24_i32 = arith.constant 24 : i32
    %69 = arith.muli %arg0, %c24_i32 : i32
    %70 = tpu.iota {dimensions = array<i32: 0>} : vector<24x1xi32>
    %71 = vector.broadcast %69 : i32 to vector<24x1xi32>
    %72 = arith.addi %70, %71 : vector<24x1xi32>
    %c40_i32 = arith.constant 40 : i32
    %73 = vector.broadcast %c40_i32 : i32 to vector<24x1xi32>
    %74 = arith.cmpi slt, %72, %73 : vector<24x1xi32>
    %75 = arith.extui %74 : vector<24x1xi1> to vector<24x1xi32>
    %76 = arith.sitofp %75 : vector<24x1xi32> to vector<24x1xf32>
    %77 = tpu.iota {dimensions = array<i32: 1>} : vector<1x24xi32>
    %78 = vector.broadcast %69 : i32 to vector<1x24xi32>
    %79 = arith.addi %77, %78 : vector<1x24xi32>
    %c40_i32_25 = arith.constant 40 : i32
    %80 = vector.broadcast %c40_i32_25 : i32 to vector<1x24xi32>
    %81 = arith.cmpi slt, %79, %80 : vector<1x24xi32>
    %82 = arith.extui %81 : vector<1x24xi1> to vector<1x24xi32>
    %83 = arith.sitofp %82 : vector<1x24xi32> to vector<1x24xf32>
    %84 = arith.subf %67, %0 : vector<24x32xf32>
    %85 = arith.mulf %84, %84 : vector<24x32xf32>
    %cst_26 = arith.constant dense<0.000000e+00> : vector<24xf32>
    %86 = vector.multi_reduction <add>, %85, %cst_26 [1] : vector<24x32xf32> to vector<24xf32>
    %87 = vector.shape_cast %86 : vector<24xf32> to vector<24x1xf32>
    %88 = arith.mulf %87, %76 : vector<24x1xf32>
    %cst_27 = arith.constant dense<0.000000e+00> : vector<1xf32>
    %89 = vector.multi_reduction <add>, %88, %cst_27 [0] : vector<24x1xf32> to vector<1xf32>
    %90 = vector.shape_cast %89 : vector<1xf32> to vector<1x1xf32>
    %91 = vector.shape_cast %90 : vector<1x1xf32> to vector<1x1x1xf32>
    %c0_28 = arith.constant 0 : index
    %c0_29 = arith.constant 0 : index
    %c0_30 = arith.constant 0 : index
    %92 = vector.load %arg8[%c0_28, %c0_29, %c0_30] : memref<1x1x1xf32, #tpu.memory_space<vmem>>, vector<1x1x1xf32>
    tpu.vector_store %arg8[%c0_28, %c0_29, %c0_30], %91 {strides = array<i32>} : memref<1x1x1xf32, #tpu.memory_space<vmem>>, vector<1x1x1xf32>,
    %cst_31 = arith.constant dense<0.000000e+00> : vector<1x64xf32>
    %93 = tpu.matmul %83, %20, %cst_31 {dimension_numbers = #tpu.dot_dimension_numbers<[1], [0], [0], [1], [0, 0, 1, 1], [], []>} : vector<1x24xf32>, vector<24x64xf32>, vector<1x64xf32> -> vector<1x64xf32>
    %94 = vector.shape_cast %93 : vector<1x64xf32> to vector<1x1x64xf32>
    %c0_32 = arith.constant 0 : index
    %c0_33 = arith.constant 0 : index
    %c0_34 = arith.constant 0 : index
    %95 = vector.load %arg7[%c0_32, %c0_33, %c0_34] : memref<1x1x64xf32, #tpu.memory_space<vmem>>, vector<1x1x64xf32>
    tpu.vector_store %arg7[%c0_32, %c0_33, %c0_34], %94 {strides = array<i32>} : memref<1x1x64xf32, #tpu.memory_space<vmem>>, vector<1x1x64xf32>,
    %96 = tpu.iota {dimensions = array<i32: 1>} : vector<1x64xi32>
    %97 = arith.sitofp %96 : vector<1x64xi32> to vector<1x64xf32>
    %cst_35 = arith.constant dense<0.000000e+00> : vector<1x24xf32>
    %98 = tpu.matmul %97, %20, %cst_35 {dimension_numbers = #tpu.dot_dimension_numbers<[1], [1], [0], [0], [0, 0, 1, 0], [], []>} : vector<1x64xf32>, vector<24x64xf32>, vector<1x24xf32> -> vector<1x24xf32>
    %99 = vector.shape_cast %98 : vector<1x24xf32> to vector<1x1x24xf32>
    %cst_36 = arith.constant 5.000000e-01 : f32
    %100 = vector.broadcast %cst_36 : f32 to vector<1x1x24xf32>
    %101 = arith.addf %99, %100 : vector<1x1x24xf32>
    %102 = arith.fptosi %101 : vector<1x1x24xf32> to vector<1x1x24xi32>
    %c0_37 = arith.constant 0 : index
    %c0_38 = arith.constant 0 : index
    %c0_39 = arith.constant 0 : index
    %103 = vector.load %arg6[%c0_37, %c0_38, %c0_39] : memref<1x1x24xi32, #tpu.memory_space<vmem>>, vector<1x1x24xi32>
    tpu.vector_store %arg6[%c0_37, %c0_38, %c0_39], %102 {strides = array<i32>} : memref<1x1x24xi32, #tpu.memory_space<vmem>>, vector<1x1x24xi32>,
    return
  }
  func.func @transform_0(%arg0: i32) -> (i32, i32) {
    %c0_i32 = arith.constant 0 : i32
    %c0_i32_0 = arith.constant 0 : i32
    return %arg0, %c0_i32 : i32, i32
  }
  func.func @transform_1(%arg0: i32) -> (i32, i32) {
    %c0_i32 = arith.constant 0 : i32
    %c0_i32_0 = arith.constant 0 : i32
    %c0_i32_1 = arith.constant 0 : i32
    return %c0_i32, %c0_i32_0 : i32, i32
  }
  func.func @transform_2(%arg0: i32) -> (i32, i32) {
    %c0_i32 = arith.constant 0 : i32
    %c0_i32_0 = arith.constant 0 : i32
    %c0_i32_1 = arith.constant 0 : i32
    return %c0_i32, %c0_i32_0 : i32, i32
  }
  func.func @transform_3(%arg0: i32) -> (i32, i32) {
    %c0_i32 = arith.constant 0 : i32
    %c0_i32_0 = arith.constant 0 : i32
    %c0_i32_1 = arith.constant 0 : i32
    return %c0_i32, %c0_i32_0 : i32, i32
  }
  func.func @transform_4(%arg0: i32) -> (i32, i32) {
    %c0_i32 = arith.constant 0 : i32
    %c0_i32_0 = arith.constant 0 : i32
    return %arg0, %c0_i32 : i32, i32
  }
  func.func @transform_5(%arg0: i32) -> (i32, i32, i32) {
    %c0_i32 = arith.constant 0 : i32
    %c0_i32_0 = arith.constant 0 : i32
    %c0_i32_1 = arith.constant 0 : i32
    return %arg0, %c0_i32, %c0_i32_0 : i32, i32, i32
  }
  func.func @transform_6(%arg0: i32) -> (i32, i32, i32) {
    %c0_i32 = arith.constant 0 : i32
    %c0_i32_0 = arith.constant 0 : i32
    %c0_i32_1 = arith.constant 0 : i32
    return %arg0, %c0_i32, %c0_i32_0 : i32, i32, i32
  }
  func.func @transform_7(%arg0: i32) -> (i32, i32, i32) {
    %c0_i32 = arith.constant 0 : i32
    %c0_i32_0 = arith.constant 0 : i32
    %c0_i32_1 = arith.constant 0 : i32
    return %arg0, %c0_i32, %c0_i32_0 : i32, i32, i32
  }
}

</mosaic_0001>

<bundles_post_ra>
// kernel: tpu_custom_call.1
= control target key start
LH: loop header
LB: loop body
LE: loop exit
PB: predicated region body
PF: predicated region fallthrough
CT: control target
= control target key end

     0   :  { %s1846_s0 = inlined_call_operand.vmem [shape: f32[48,32], index: 0, kind: input, shape index: {}]   ;;  %s1847_s1 = inlined_call_operand.vmem [shape: f32[32,64], index: 1, kind: input, shape index: {}]   ;;  %s1848_s2 = inlined_call_operand.vmem [shape: f32[64,32], index: 2, kind: input, shape index: {}]   ;;  %s1849_s3 = inlined_call_operand.vmem [shape: f32[1,64], index: 3, kind: input, shape index: {}]   ;;  %s1850_s4 = inlined_call_operand.vmem [shape: f32[48,32], index: 4, kind: output, shape index: {0}]   ;;  %s1851_s5 = inlined_call_operand.hbm [shape: s32[2,1,24], index: 5, kind: output, shape index: {1}]   ;;  %s1852_s6 = inlined_call_operand.hbm [shape: f32[2,1,64], index: 6, kind: output, shape index: {2}]   ;;  %s1853_s7 = inlined_call_operand.vmem [shape: f32[2,1,1], index: 7, kind: output, shape index: {3}]  }
   0x1   :  { %1854 = sst [smem:[#allocation8_spill]] %s1846_s0 }
   0x2   :  { %13 = vsyncpa [#allocation3], 0 }
   0x3   :  { %15 = vsyncpa [#allocation3 + $0x1], 0 }
   0x4   :  { %16 = vsyncpa [#allocation5], 0 }
   0x5   :  { %18 = vsyncpa [#allocation5 + $0x1], 0  ;;  %s1517_s24 = smov 0   ;;  %s1519_s25 = smov 0  }
   0x6   :  { %s1521_s26 = smov 0   ;;  %s1523_s27 = smov 0  }
   0x7 LB: > { %s1538_s28 = sadd.s32 4294967295, %s1468_s27   ;;  %s1141_s29 = sadd.s32 4294967294, %s1468_s27   ;;  %s1468_s27 = sphi %s1523_s27, %s1861_s27   ;;  %s1464_s26 = sphi %s1521_s26, %s1860_s26   ;;  %s1460_s25 = sphi %s1519_s25, %s1859_s25   ;;  %s1456_s24 = sphi %s1517_s24, %s1858_s24  }
   0x8   : > { %s1542_s30 = sadd.s32 1, %s1468_s27   ;;  %s146_s8 = sadd.s32 1, %s1464_s26 }
   0x9   : > { %s143_s9 = ssub.s32 %s1468_s27, %s1542_s30  ;;  %p156_p0 = scmp.ne.s32.totalorder %s1464_s26, %s1460_s25 }
   0xa   : > { %p144_p1 = scmp.eq.s32.totalorder %s143_s9, 0  ;;  %p157_p2 = scmp.eq.s32.totalorder %s1538_s28, 1 }
   0xb   : > { %p162_p3 = scmp.ne.s32.totalorder %s1460_s25, %s1456_s24  ;;  %p163_p4 = scmp.eq.s32.totalorder %s1141_s29, 1 }
   0xc   : > { %s1553_s10 = scalar_select %p144_p1, %s1464_s26, %s146_s8  }
   0xd   : > { %p1555_p5 = por %p157_p2, %p156_p0  ;;  %p1559_p6 = por %p163_p4, %p162_p3 }
   0xe   : > { %p1144_p7 = scmp.ge.s32.totalorder %s1468_s27, 1  ;;  %p251_p8 = scmp.lt.s32.totalorder %s1468_s27, 3 }
  0x10   : > { %p252_p9 = pnand %p1144_p7, %p251_p8 }
  0x11   : > { %v312_v0 = vld [vmem:[%s1847_s1] sm:$0xff] (!%p252_p9)  ;;  %v313_v1 = vld [vmem:[%s1847_s1 + $0x8] sm:$0xff] (!%p252_p9)  ;;  %v314_v2 = vld [vmem:[%s1847_s1 + $0x10] sm:$0xff] (!%p252_p9)  ;;  %v1470_v3 = vmov (!%p252_p9), 0.0|0.0   ;;  %vm1471_vm0 = vmmov (!%p252_p9), 0   ;;  %v1472_v6 = vmov (!%p252_p9), 0.0   ;;  %v419_v27 = vlaneseq (!%p252_p9) }
  0x12   : > { %255 = sbr.rel (%p252_p9) target bundleno = 1576 (0x628), region = 36  ;;  %1262 = vmatprep.subr.bf16.mxu0 (!%p252_p9), %v1470_v3  ;;  %v1263_v4 = vpack.c.bf16 (!%p252_p9), %v313_v1, %v312_v0  ;;  %v315_v5 = vld [vmem:[%s1847_s1 + $0x18] sm:$0xff] (!%p252_p9)  ;;  %1210 = vmatprep.mubr.msk.f32.mxu0 (!%p252_p9), %vm1471_vm0, %v1472_v6  ;;  %vm316_vm1 = vcmask (!%p252_p9), 261120   ;;  %s1857_s0 = sld [smem:[#allocation8_spill]] (!%p252_p9)  ;;  %v1150_v12 = vld [vmem:[%s1849_s3] ss:$0 sm:$0xff] (!%p252_p9) }
  0x13   : > { %s294_s21 = smul.u32 (!%p252_p9), 3, %s1538_s28  ;;  %1268 = vmatprep.subr.bf16.mxu1 (!%p252_p9), %v1470_v3  ;;  %1235 = vmatprep.mubr.msk.f32.mxu1 (!%p252_p9), %vm1471_vm0, %v1472_v6  ;;  %v1266_v7 = vpack.c.bf16 (!%p252_p9), %v315_v5, %v314_v2  ;;  %vm421_vm2 = vcmask (!%p252_p9), 523264   ;;  %v1619_v28 = vand.u32 (!%p252_p9), 127, %v419_v27  ;;  %v491_v44 = vld [vmem:[%s1848_s2] sm:$0xff] (!%p252_p9)  ;;  %v492_v45 = vld [vmem:[%s1848_s2 + $0x8] sm:$0xff] (!%p252_p9)  ;;  %v493_v46 = vld [vmem:[%s1848_s2 + $0x10] sm:$0xff] (!%p252_p9) }
  0x14   : > { %1264 = vmatpush3.bf16.msra.mxu0 (!%p252_p9), %v1263_v4  ;;  %v1269_v47 = vpack.c.bf16 (!%p252_p9), %v492_v45, %v491_v44  ;;  %v494_v48 = vld [vmem:[%s1848_s2 + $0x18] sm:$0xff] (!%p252_p9)  ;;  %v495_v50 = vld [vmem:[%s1848_s2 + $0x20] sm:$0xff] (!%p252_p9)  ;;  %v496_v51 = vld [vmem:[%s1848_s2 + $0x28] sm:$0xff] (!%p252_p9)  ;;  %s765_s18 = smul.u32 (!%p252_p9), 24, %s1538_s28 }
  0x15   : > { %p295_p10 = scmp.lt.s32.totalorder (!%p252_p9), %s294_s21, 5  ;;  %1265 = vmatprep.subr.bf16.mxu0 (!%p252_p9), %v1470_v3  ;;  %v1272_v49 = vpack.c.bf16 (!%p252_p9), %v494_v48, %v493_v46  ;;  %v1275_v52 = vpack.c.bf16 (!%p252_p9), %v496_v51, %v495_v50  ;;  %v497_v1 = vld [vmem:[%s1848_s2 + $0x30] sm:$0xff] (!%p252_p9)  ;;  %v498_v2 = vld [vmem:[%s1848_s2 + $0x38] sm:$0xff] (!%p252_p9)  ;;  %vm1285_vm11 = vmpackc.low (!%p252_p9), %vm421_vm2, %vm421_vm2 }
  0x16   : > { %1270 = vmatpush3.bf16.msra.mxu1 (!%p252_p9), %v1269_v47  ;;  %v1278_v4 = vpack.c.bf16 (!%p252_p9), %v498_v2, %v497_v1 }
  0x17   : > { %1271 = vmatprep.subr.bf16.mxu1 (!%p252_p9), %v1470_v3 }
  0x18   : > { %1267 = vmatpush3.bf16.msra.mxu0 (!%p252_p9), %v1266_v7 }
  0x19   : > { %s1863_s21 = smov (!%p295_p10, %s294_s21), 5  ;;  %1280 = vmatprep.subr.bf16.mxu0 %v1470_v3 }
  0x1a   : > { %s1145_s22 = sshll.u32 %s1863_s21, 3  ;;  %1273 = vmatpush3.bf16.msra.mxu1 %v1272_v49  ;;  %s1758_s21 = sand.u32 1, %s1460_s25  }
  0x1b   : > { %s298_s8 = scalar_lea.vmem %s1857_s0, %s1145_s22  ;;  %1274 = vmatprep.subr.bf16.mxu1 %v1470_v3  ;;  %s304_s23 = scalar_lea.vmem %s1850_s4, %s1145_s22 }
  0x1c   : > { %v1594_v8 = vld [vmem:[%s298_s8] sm:$0xff]  ;;  %v1600_v9 = vld [vmem:[%s298_s8 + $0x8] sm:$0xff]  ;;  %v1606_v10 = vld [vmem:[%s298_s8 + $0x10] sm:$0xff]  ;;  %s1172_s22 = sshll.u32 %s1538_s28, 4  ;;  %s282_s29 = scalar_lea.vmem [#allocation2], %s1758_s21 }
  0x1d   : > { %1211 = vmatmul.mubr.msk.f32.vlgmr.msra.gmra.mrb[0].mxu0 %vm316_vm1, %v1594_v8  ;;  %v588_v5 = vmul.f32 %v1594_v8, %v1594_v8  ;;  %v589_v7 = vmul.f32 %v1600_v9, %v1600_v9  ;;  %s998_s8 = sshll.u32 %s282_s29, 4  ;;  %s288_s9 = scalar_lea.vmem [#allocation4], %s1758_s21  ;;  %s999_s8 = int_to_ptr.vmem [resolvable:$true] %s998_s8 }
  0x1e   : > { %1213 = vmatprep.mubr.msk.f32.mxu0 %vm1471_vm0, %v1472_v6  ;;  %1276 = vmatpush3.bf16.msra.mxu1 %v1275_v52  ;;  %s1770_s15 = scalar_lea.hbm %s1851_s5, %s1172_s22  ;;  %s975_s16 = scalar_lea.sflag [#allocation3], %s1758_s21 }
  0x1f   : > { %1277 = vmatprep.subr.bf16.mxu1 %v1470_v3  ;;  %s1374_s17 = scalar_lea.vmem %s999_s8, 16 }
  0x20   : > { %p1375_p11 = scmp.ne.s32.totalorder %s999_s8, %s1374_s17 }
  0x21   : > { %1214 = vmatmul.mubr.msk.f32.gmra.mrb[2].mxu0 %vm316_vm1, %v1600_v9 }
  0x22   : > { %1216 = vmatprep.mubr.msk.f32.mxu0 %vm1471_vm0, %v1472_v6  ;;  %1279 = vmatpush3.bf16.msra.mxu1 %v1278_v4  ;;  %p1376_p12 = pnand %p1375_p11, %p1555_p5 }
  0x23   : > { %1283 = vmatprep.subr.bf16.mxu1 %v1470_v3 }
  0x24   : > { %p1377_p13 = pneg %p1376_p12 }
  0x25   : > { %1217 = vmatmul.mubr.msk.f32.gmra.mrb[4].mxu0 %vm316_vm1, %v1606_v10 }
  0x26   : > { %1250 = vmatprep.mubr.msk.f32.mxu0 %vm1471_vm0, %v1472_v6 }
  0xf0   : > { %v392_v11 = vpop.f32.mrb[0].mxu0 }
  0xf1   : > { %v407_v13 = vmul.f32 2.0, %v392_v11  ;;  %v1212_v14 = vpop.f32.mrb[1].mxu0  ;;  %v591_v11 = vsel %vm316_vm1, %v588_v5, 0.0 }
  0xf3   : > { %v416_v15 = vsub.f32 %v1150_v12, %v407_v13 }
  0xf4   : > { %v397_v16 = vpop.f32.mrb[2].mxu0 }
  0xf5   : > { %v408_v17 = vmul.f32 2.0, %v397_v16  ;;  %v1215_v18 = vpop.f32.mrb[3].mxu0  ;;  %v422_v19 = vsel %vm421_vm2, %v416_v15, inf }
  0xf6   : > { %423 = vmin.xlane.f32.xlu0 %v422_v19 }
  0xf7   : > { %v417_v20 = vsub.f32 %v1150_v12, %v408_v17 }
  0xf8   : > { %v402_v21 = vpop.f32.mrb[4].mxu0 }
  0xf9   : > { %v409_v22 = vmul.f32 2.0, %v402_v21  ;;  %v1218_v23 = vpop.f32.mrb[5].mxu0  ;;  %v425_v24 = vsel %vm421_vm2, %v417_v20, inf }
  0xfa   : > { %426 = vmin.xlane.f32.xlu0 %v425_v24 }
  0xfb   : > { %v418_v25 = vsub.f32 %v1150_v12, %v409_v22  ;;  %v594_v12 = vsel %vm316_vm1, %v589_v7, 0.0 }
  0xfd   : > { %v428_v26 = vsel %vm421_vm2, %v418_v25, inf }
  0xfe   : > { %429 = vmin.xlane.f32.xlu1 %v428_v26 }
 0x183   : > { %v424_v29 = vpop.xlane.xlu0 %423 }
 0x184   : > { %vm431_vm3 = vcmp.le.f32.partialorder %v416_v15, %v424_v29 }
 0x185   : > { %v434_v30 = vsel %vm431_vm3, %v1619_v28, 64 }
 0x186   : > { %v437_v31 = vsel %vm421_vm2, %v434_v30, 2147483647 }
 0x187   : > { %v427_v32 = vpop.xlane.xlu0 %426  ;;  %v439_v33 = vshra.s32 %v437_v31, 16  ;;  %v438_v53 = vand.u32 65535, %v437_v31 }
 0x188   : > { %vm432_vm4 = vcmp.le.f32.partialorder %v417_v20, %v427_v32  ;;  %v1473_v32 = vmov 1.0|1.0  }
 0x189   : > { %v435_v34 = vsel %vm432_vm4, %v1619_v28, 64  ;;  %v441_v35 = vcvt.s32.f32 %v439_v33  ;;  %v440_v55 = vcvt.s32.f32 %v438_v53 }
 0x18a   : > { %v452_v36 = vsel %vm421_vm2, %v435_v34, 2147483647  ;;  %v1474_v34 = vmov 1.0  }
 0x18b   : > { %442 = vmin.xlane.f32.xlu1 %v441_v35  ;;  %v430_v37 = vpop.xlane.xlu1 %429  ;;  %v454_v38 = vshra.s32 %v452_v36, 16  ;;  %v453_v56 = vand.u32 65535, %v452_v36 }
 0x18c   : > { %vm433_vm5 = vcmp.le.f32.partialorder %v418_v25, %v430_v37 }
 0x18d   : > { %v436_v39 = vsel %vm433_vm5, %v1619_v28, 64  ;;  %v456_v40 = vcvt.s32.f32 %v454_v38  ;;  %v455_v59 = vcvt.s32.f32 %v453_v56  ;;  %v590_v38 = vmul.f32 %v1606_v10, %v1606_v10 }
 0x18e   : > { %v467_v41 = vsel %vm421_vm2, %v436_v39, 2147483647 }
 0x18f   : > { %457 = vmin.xlane.f32.xlu0 %v456_v40  ;;  %v469_v42 = vshra.s32 %v467_v41, 16  ;;  %v468_v60 = vand.u32 65535, %v467_v41 }
 0x191   : > { %v471_v43 = vcvt.s32.f32 %v469_v42  ;;  %v470_v63 = vcvt.s32.f32 %v468_v60 }
 0x193   : > { %472 = vmin.xlane.f32.xlu1 %v471_v43 }
 0x218   : > { %v443_v54 = vpop.xlane.xlu1 %442 }
 0x219   : > { %vm444_vm6 = vcmp.eq.f32.partialorder %v441_v35, %v443_v54  ;;  %v449_v13 = vcvt.f32.s32 %v443_v54 }
 0x21a   : > { %v445_v57 = vsel %vm444_vm6, %v440_v55, inf }
 0x21b   : > { %446 = vmin.xlane.f32.xlu0 %v445_v57  ;;  %v450_v15 = vshll.u32 %v449_v13, 16 }
 0x21c   : > { %v458_v58 = vpop.xlane.xlu0 %457 }
 0x21d   : > { %vm459_vm7 = vcmp.eq.f32.partialorder %v456_v40, %v458_v58  ;;  %v464_v16 = vcvt.f32.s32 %v458_v58 }
 0x21e   : > { %v460_v61 = vsel %vm459_vm7, %v455_v59, inf }
 0x21f   : > { %461 = vmin.xlane.f32.xlu1 %v460_v61  ;;  %v465_v3 = vshll.u32 %v464_v16, 16 }
 0x220   : > { %v473_v62 = vpop.xlane.xlu1 %472 }
 0x221   : > { %vm474_vm8 = vcmp.eq.f32.partialorder %v471_v43, %v473_v62  ;;  %v479_v20 = vcvt.f32.s32 %v473_v62  ;;  %v597_v43 = vsel %vm316_vm1, %v590_v38, 0.0 }
 0x222   : > { %v475_v0 = vsel %vm474_vm8, %v470_v63, inf }
 0x223   : > { %476 = vmin.xlane.f32.xlu0 %v475_v0  ;;  %592 = vadd.xlane.f32.xlu1 %v591_v11  ;;  %v480_v25 = vshll.u32 %v479_v20, 16 }
 0x227   : > { %595 = vadd.xlane.f32.xlu0 %v594_v12 }
 0x2a8   : > { %v447_v14 = vpop.xlane.xlu0 %446 }
 0x2a9   : > { %v448_v17 = vcvt.f32.s32 %v447_v14 }
 0x2ab   : > { %v451_v18 = vadd.s32 %v450_v15, %v448_v17 }
 0x2ac   : > { %v462_v19 = vpop.xlane.xlu1 %461 }
 0x2ad   : > { %v463_v21 = vcvt.f32.s32 %v462_v19  ;;  %vm482_vm9 = vcmp.eq.s32.totalorder %v1619_v28, %v451_v18 }
 0x2ae   : > { %v1151_v22 = vsel %vm482_vm9, 1.0, %v1472_v6 }
 0x2af   : > { %v466_v23 = vadd.s32 %v465_v3, %v463_v21  ;;  %1236 = vmatmul.mubr.msk.f32.vlgmr.msra.gmra.mrb[0].mxu1 %vm421_vm2, %v1151_v22 }
 0x2b0   : > { %v477_v24 = vpop.xlane.xlu0 %476  ;;  %1238 = vmatprep.mubr.msk.f32.mxu1 %vm1471_vm0, %v1472_v6  ;;  %v593_v49 = vpop.xlane.xlu1 %592 }
 0x2b1   : > { %v478_v26 = vcvt.f32.s32 %v477_v24  ;;  %vm483_vm10 = vcmp.eq.s32.totalorder %v1619_v28, %v466_v23  ;;  %1338 = vrsqrt.f32 %v593_v49  ;;  %vm614_vm14 = vcmp.eq.f32.partialorder %v593_v49, inf }
 0x2b2   : > { %v1152_v29 = vsel %vm483_vm10, 1.0, %v1472_v6  ;;  %vm1281_vm12 = vmpackc.low %vm483_vm10, %vm482_vm9  ;;  %v617_v57 = vand.u32 2147483648, %v593_v49  ;;  %vm616_vm15 = vcmp.eq.f32.partialorder %v593_v49, 0.0 }
 0x2b3   : > { %v481_v30 = vadd.s32 %v480_v25, %v478_v26  ;;  %1239 = vmatmul.mubr.msk.f32.gmra.mrb[2].mxu1 %vm421_vm2, %v1152_v29  ;;  %v1284_v31 = vpack.c.bf16 %v1152_v29, %v1151_v22  ;;  %1282 = vmatpush3.bf16.msk.msra.mxu0 %vm1281_vm12, %v1473_v32  ;;  %vm815_vm12 = vcmask 195584  }
 0x2b4   : > { %1241 = vmatprep.mubr.msk.f32.mxu1 %vm1471_vm0, %v1472_v6  ;;  %1248 = vmatprep.subr.mxu0 %v1472_v6  ;;  %v596_v50 = vpop.xlane.xlu0 %595 }
 0x2b5   : > { %1286 = vmatpush3.bf16.xpose.msk.msra.mxu1 %vm1285_vm11, %v1284_v31  ;;  %vm484_vm13 = vcmp.eq.s32.totalorder %v1619_v28, %v481_v30  ;;  %1340 = vrsqrt.f32 %v596_v50  ;;  %v624_v61 = vand.u32 2147483648, %v596_v50  ;;  %vm623_vm3 = vcmp.eq.f32.partialorder %v596_v50, 0.0 }
 0x2b6   : > { %v1153_v33 = vsel %vm484_vm13, 1.0, %v1472_v6  ;;  %1257 = vmatprep.subr.mxu1 %v1472_v6 }
 0x2b7   : > { %1242 = vmatmul.mubr.msk.f32.gmra.mrb[4].mxu1 %vm421_vm2, %v1153_v33  ;;  %1249 = vmatpush3.msk.msra.mxu0 %vm484_vm13, %v1474_v34 }
 0x2b8   : > { %1259 = vmatprep.mubr.msk.f32.mxu1 %vm1471_vm0, %v1472_v6  ;;  %vm621_vm0 = vcmp.eq.f32.partialorder %v596_v50, inf }
 0x2bb   : > { %v1339_v51 = vpop.eup %1338 }
 0x2bc   : > { %v613_v53 = vmul.f32 %v1339_v51, %v593_v49 }
 0x2bd   : > { %1258 = vmatpush3.xpose.msk.msra.mxu1 %vm421_vm2, %v1153_v33 }
 0x2be   : > { %v615_v59 = vsel %vm614_vm14, %v593_v49, %v613_v53 }
 0x2bf   : > { %v1341_v54 = vpop.eup %1340  ;;  %v618_v62 = vsel %vm616_vm15, %v617_v57, %v615_v59 }
 0x2c0   : > { %v620_v58 = vmul.f32 %v1341_v54, %v596_v50  ;;  %v633_v1 = vmax.f32 %v618_v62, 1e-12 }
 0x2c2   : > { %v622_v63 = vsel %vm621_vm0, %v596_v50, %v620_v58 }
 0x2c3   : > { %v625_v4 = vsel %vm623_vm3, %v624_v61, %v622_v63 }
 0x2c4   : > { %v634_v14 = vmax.f32 %v625_v4, 1e-12 }
 0x382   : > { %v1681_v35 = vpop.f32.mrb[0].mxu1 }
 0x383   : > { %v600_v36 = vmul.f32 %v1681_v35, %v1681_v35  ;;  %v1237_v37 = vpop.f32.mrb[1].mxu1 }
 0x385   : > { %v603_v39 = vsel %vm316_vm1, %v600_v36, 0.0 }
 0x386   : > { %604 = vadd.xlane.f32.xlu1 %v603_v39  ;;  %v1688_v40 = vpop.f32.mrb[2].mxu1 }
 0x387   : > { %v601_v41 = vmul.f32 %v1688_v40, %v1688_v40  ;;  %v1240_v42 = vpop.f32.mrb[3].mxu1 }
 0x389   : > { %v606_v44 = vsel %vm316_vm1, %v601_v41, 0.0 }
 0x38a   : > { %598 = vadd.xlane.f32.xlu1 %v597_v43  ;;  %607 = vadd.xlane.f32.xlu0 %v606_v44  ;;  %v1694_v45 = vpop.f32.mrb[4].mxu1 }
 0x38b   : > { %v602_v46 = vmul.f32 %v1694_v45, %v1694_v45  ;;  %v1243_v47 = vpop.f32.mrb[5].mxu1 }
 0x38d   : > { %v609_v48 = vsel %vm316_vm1, %v602_v46, 0.0 }
 0x38e   : > { %610 = vadd.xlane.f32.xlu0 %v609_v48 }
 0x413   : > { %v605_v52 = vpop.xlane.xlu1 %604 }
 0x414   : > { %1342 = vrsqrt.f32 %v605_v52  ;;  %vm647_vm4 = vcmp.eq.f32.partialorder %v605_v52, inf  ;;  %v650_v5 = vand.u32 2147483648, %v605_v52  ;;  %vm649_vm5 = vcmp.eq.f32.partialorder %v605_v52, 0.0 }
 0x417   : > { %v608_v55 = vpop.xlane.xlu0 %607  ;;  %v599_v56 = vpop.xlane.xlu1 %598 }
 0x418   : > { %1344 = vrsqrt.f32 %v608_v55  ;;  %vm654_vm6 = vcmp.eq.f32.partialorder %v608_v55, inf  ;;  %vm656_vm7 = vcmp.eq.f32.partialorder %v608_v55, 0.0  ;;  %v657_v17 = vand.u32 2147483648, %v608_v55 }
 0x419   : > { %1346 = vrsqrt.f32 %v599_v56  ;;  %vm628_vm8 = vcmp.eq.f32.partialorder %v599_v56, inf  ;;  %v631_v3 = vand.u32 2147483648, %v599_v56  ;;  %vm630_vm9 = vcmp.eq.f32.partialorder %v599_v56, 0.0 }
 0x41b   : > { %v611_v60 = vpop.xlane.xlu0 %610 }
 0x41c   : > { %1348 = vrsqrt.f32 %v611_v60  ;;  %vm661_vm10 = vcmp.eq.f32.partialorder %v611_v60, inf  ;;  %v664_v29 = vand.u32 2147483648, %v611_v60  ;;  %vm663_vm11 = vcmp.eq.f32.partialorder %v611_v60, 0.0 }
 0x41d   : > { %1350 = vrcp.f32 %v633_v1 }
 0x41e   : > { %v1343_v0 = vpop.eup %1342 }
 0x41f   : > { %v646_v2 = vmul.f32 %v1343_v0, %v605_v52 }
 0x421   : > { %v648_v7 = vsel %vm647_vm4, %v605_v52, %v646_v2 }
 0x422   : > { %v1345_v11 = vpop.eup %1344  ;;  %v651_v12 = vsel %vm649_vm5, %v650_v5, %v648_v7 }
 0x423   : > { %v1347_v13 = vpop.eup %1346  ;;  %v666_v15 = vmax.f32 %v651_v12, 1e-12  ;;  %v653_v16 = vmul.f32 %v1345_v11, %v608_v55 }
 0x424   : > { %v627_v18 = vmul.f32 %v1347_v13, %v599_v56 }
 0x425   : > { %1352 = vrcp.f32 %v666_v15  ;;  %v655_v19 = vsel %vm654_vm6, %v608_v55, %v653_v16  ;;  %v891_v55 = vcvt.s32.f32 %v1619_v28 }
 0x426   : > { %v1349_v20 = vpop.eup %1348  ;;  %v658_v21 = vsel %vm656_vm7, %v657_v17, %v655_v19  ;;  %v629_v22 = vsel %vm628_vm8, %v599_v56, %v627_v18  ;;  %1354 = vrcp.f32 %v634_v14  ;;  %v1723_v56 = vstv %s765_s18  ;;  %s1475_s18 = smov [#allocation2]  }
 0x427   : > { %v667_v23 = vmax.f32 %v658_v21, 1e-12  ;;  %v632_v24 = vsel %vm630_vm9, %v631_v3, %v629_v22  ;;  %v660_v25 = vmul.f32 %v1349_v20, %v611_v60  ;;  %v1351_v33 = vpop.eup %1350  ;;  %1260 = vmatmul.mubr.msk.f32.vlgmr.msra.gmra.mrb[6].mxu1 %vm421_vm2, %v891_v55  ;;  %vm889_vm8 = vcmask 516096   ;;  %s1378_s19 = sshll.u32 %s1475_s18, 4  ;;  %s1379_s19 = int_to_ptr.vmem [resolvable:$false] %s1378_s19 }
 0x428   : > { %v635_v26 = vmax.f32 %v632_v24, 1e-12  ;;  %v642_v36 = vmul.f32 %v1351_v33, %v1594_v8  ;;  %vm967_vm9 = vcmask 188416   ;;  %s1380_s20 = scalar_lea.vmem %s1379_s19, 32  ;;  %p1381_p0 = scmp.lt.s32.totalorder %s999_s8, %s1379_s19 }
 0x429   : > { %1356 = vrcp.f32 %v667_v23  ;;  %v662_v30 = vsel %vm661_vm10, %v611_v60, %v660_v25  ;;  %p1382_p1 = scmp.lt.s32.totalorder %s1380_s20, %s1374_s17 }
 0x42a   : > { %v665_v31 = vsel %vm663_vm11, %v664_v29, %v662_v30  ;;  %1358 = vrcp.f32 %v635_v26 }
 0x42b   : > { %v668_v32 = vmax.f32 %v665_v31, 1e-12  ;;  %p1383_p2 = por %p1382_p1, %p1381_p0 }
 0x42d   : > { %1360 = vrcp.f32 %v668_v32  ;;  %p1384_p3 = pnand %p1383_p2, %p1377_p13 }
 0x42f   : > { %v1353_v34 = vpop.eup %1352 }
 0x430   : > { %v675_v37 = vmul.f32 %v1353_v34, %v1681_v35  ;;  %v1355_v38 = vpop.eup %1354 }
 0x431   : > { %v643_v43 = vmul.f32 %v1355_v38, %v1600_v9 }
 0x432   : > { %v1701_v39 = vsub.f32 %v642_v36, %v675_v37 }
 0x433   : > { %v1357_v41 = vpop.eup %1356 }
 0x434   : > { %v681_v42 = vmul.f32 %v1701_v39, %v1701_v39  ;;  %v676_v44 = vmul.f32 %v1357_v41, %v1688_v40  ;;  %v1359_v46 = vpop.eup %1358 }
 0x435   : > { %v644_v50 = vmul.f32 %v1359_v46, %v1606_v10 }
 0x436   : > { %v684_v47 = vsel %vm316_vm1, %v681_v42, 0.0  ;;  %v1708_v48 = vsub.f32 %v643_v43, %v676_v44 }
 0x437   : > { %v1361_v49 = vpop.eup %1360  ;;  %685 = vadd.xlane.f32.xlu1 %v684_v47 }
 0x438   : > { %v682_v35 = vmul.f32 %v1708_v48, %v1708_v48  ;;  %v677_v51 = vmul.f32 %v1361_v49, %v1694_v45  ;;  %v783_v45 = vadd.s32 %v1723_v56, %v1619_v28 }
 0x43a   : > { %v687_v52 = vsel %vm316_vm1, %v682_v35, 0.0  ;;  %v1715_v53 = vsub.f32 %v644_v50, %v677_v51  ;;  %vm784_vm13 = vcmp.lt.s32.totalorder %v783_v45, 40 }
 0x43b   : > { %688 = vadd.xlane.f32.xlu0 %v687_v52  ;;  %v1163_v57 = vsel %vm784_vm13, 1.0, %v1472_v6 }
 0x43c   : > { %v683_v40 = vmul.f32 %v1715_v53, %v1715_v53  ;;  %1251 = vmatmul.mubr.msk.f32.vlgmr.msra.gmra.mrb[6].mxu0 %vm815_vm12, %v1163_v57 }
 0x43e   : > { %v690_v54 = vsel %vm316_vm1, %v683_v40, 0.0 }
 0x43f   : > { %691 = vadd.xlane.f32.xlu1 %v690_v54 }
 0x4c4   : > { %v686_v58 = vpop.xlane.xlu1 %685 }
 0x4c5   : > { %1362 = vrsqrt.f32 %v686_v58  ;;  %vm695_vm14 = vcmp.eq.f32.partialorder %v686_v58, inf  ;;  %v698_v63 = vand.u32 2147483648, %v686_v58  ;;  %vm697_vm2 = vcmp.eq.f32.partialorder %v686_v58, 0.0 }
 0x4c8   : > { %v689_v59 = vpop.xlane.xlu0 %688 }
 0x4c9   : > { %1364 = vrsqrt.f32 %v689_v59  ;;  %vm702_vm15 = vcmp.eq.f32.partialorder %v689_v59, inf  ;;  %v705_v5 = vand.u32 2147483648, %v689_v59  ;;  %vm704_vm0 = vcmp.eq.f32.partialorder %v689_v59, 0.0 }
 0x4cc   : > { %v692_v60 = vpop.xlane.xlu1 %691 }
 0x4cd   : > { %1366 = vrsqrt.f32 %v692_v60  ;;  %vm709_vm3 = vcmp.eq.f32.partialorder %v692_v60, inf  ;;  %v712_v15 = vand.u32 2147483648, %v692_v60  ;;  %vm711_vm4 = vcmp.eq.f32.partialorder %v692_v60, 0.0 }
 0x4cf   : > { %v1363_v61 = vpop.eup %1362 }
 0x4d0   : > { %v694_v62 = vmul.f32 %v1363_v61, %v686_v58 }
 0x4d2   : > { %v696_v0 = vsel %vm695_vm14, %v686_v58, %v694_v62 }
 0x4d3   : > { %v1365_v1 = vpop.eup %1364  ;;  %v699_v2 = vsel %vm697_vm2, %v698_v63, %v696_v0 }
 0x4d4   : > { %v701_v28 = vmul.f32 %v1365_v1, %v689_v59  ;;  %v723_v4 = vadd.f32 1e-08, %v699_v2  ;;  %vm714_vm5 = vcmp.gt.f32.partialorder %v699_v2, 1e-05 }
 0x4d5   : > { %v1157_v19 = vsel %vm714_vm5, 1.0, %v1472_v6 }
 0x4d6   : > { %v703_v7 = vsel %vm702_vm15, %v689_v59, %v701_v28  ;;  %1368 = vrcp.f32 %v723_v4  ;;  %v732_v21 = vsub.f32 1.0, %v1157_v19 }
 0x4d7   : > { %v1367_v11 = vpop.eup %1366  ;;  %v706_v12 = vsel %vm704_vm0, %v705_v5, %v703_v7 }
 0x4d8   : > { %v708_v13 = vmul.f32 %v1367_v11, %v692_v60  ;;  %v724_v14 = vadd.f32 1e-08, %v706_v12  ;;  %vm715_vm6 = vcmp.gt.f32.partialorder %v706_v12, 1e-05 }
 0x4d9   : > { %v1158_v22 = vsel %vm715_vm6, 1.0, %v1472_v6 }
 0x4da   : > { %v710_v16 = vsel %vm709_vm3, %v692_v60, %v708_v13  ;;  %1370 = vrcp.f32 %v724_v14  ;;  %v733_v29 = vsub.f32 1.0, %v1158_v22 }
 0x4db   : > { %v713_v17 = vsel %vm711_vm4, %v712_v15, %v710_v16 }
 0x4dc   : > { %v725_v18 = vadd.f32 1e-08, %v713_v17  ;;  %vm716_vm7 = vcmp.gt.f32.partialorder %v713_v17, 1e-05 }
 0x4dd   : > { %v1159_v30 = vsel %vm716_vm7, 1.0, %v1472_v6 }
 0x4de   : > { %1372 = vrcp.f32 %v725_v18  ;;  %v734_v38 = vsub.f32 1.0, %v1159_v30 }
 0x4e0   : > { %v1369_v3 = vpop.eup %1368 }
 0x4e1   : > { %v727_v20 = vmul.f32 %v1369_v3, %v1157_v19 }
 0x4e3   : > { %v735_v23 = vadd.f32 %v732_v21, %v727_v20 }
 0x4e4   : > { %v1371_v24 = vpop.eup %1370 }
 0x4e5   : > { %v738_v25 = vmul.f32 %v735_v23, %v1701_v39  ;;  %v729_v26 = vmul.f32 %v1371_v24, %v1158_v22 }
 0x4e7   : > { %v741_v31 = vmul.f32 %v738_v25, %v1594_v8  ;;  %v736_v32 = vadd.f32 %v733_v29, %v729_v26  ;;  %v753_v47 = vmul.f32 2.0, %v738_v25 }
 0x4e8   : > { %v1373_v33 = vpop.eup %1372 }
 0x4e9   : > { %v744_v34 = vsel %vm316_vm1, %v741_v31, 0.0  ;;  %v739_v36 = vmul.f32 %v736_v32, %v1708_v48  ;;  %v731_v37 = vmul.f32 %v1373_v33, %v1159_v30 }
 0x4ea   : > { %745 = vadd.xlane.f32.xlu0 %v744_v34 }
 0x4eb   : > { %v742_v41 = vmul.f32 %v739_v36, %v1600_v9  ;;  %v737_v42 = vadd.f32 %v734_v38, %v731_v37  ;;  %v754_v50 = vmul.f32 2.0, %v739_v36 }
 0x4ed   : > { %v747_v39 = vsel %vm316_vm1, %v742_v41, 0.0  ;;  %v740_v43 = vmul.f32 %v737_v42, %v1715_v53 }
 0x4ee   : > { %748 = vadd.xlane.f32.xlu1 %v747_v39 }
 0x4ef   : > { %v743_v44 = vmul.f32 %v740_v43, %v1606_v10  ;;  %v755_v54 = vmul.f32 2.0, %v740_v43 }
 0x4f1   : > { %v750_v46 = vsel %vm316_vm1, %v743_v44, 0.0 }
 0x4f2   : > { %751 = vadd.xlane.f32.xlu0 %v750_v46 }
 0x4fa   : > { %v961_v1 = vpop.f32.mrb[6].mxu1 }
 0x4fb   : > { %v1261_v2 = vpop.f32.mrb[7].mxu1 }
 0x50f   : > { %v885_v5 = vpop.f32.mrb[6].mxu0 }
 0x510   : > { %890 = vst.msk [vmem:[%s288_s9] sm:$0x1] %vm889_vm8, %v885_v5 }
 0x577   : > { %v746_v49 = vpop.xlane.xlu0 %745 }
 0x578   : > { %v756_v35 = vmul.f32 %v753_v47, %v746_v49 }
 0x57a   : > { %v759_v48 = vsub.f32 %v1594_v8, %v756_v35 }
 0x57b   : > { %v749_v51 = vpop.xlane.xlu1 %748 }
 0x57c   : > { %762 = vst.msk [vmem:[%s304_s23] sm:$0xff] %vm316_vm1, %v759_v48  ;;  %v757_v52 = vmul.f32 %v754_v50, %v749_v51  ;;  %v787_v53 = vsub.f32 %v759_v48, %v1594_v8 }
 0x57e   : > { %v760_v40 = vsub.f32 %v1600_v9, %v757_v52  ;;  %v790_v55 = vmul.f32 %v787_v53, %v787_v53 }
 0x57f   : > { %v752_v45 = vpop.xlane.xlu0 %751 }
 0x580   : > { %763 = vst.msk [vmem:[%s304_s23 + $0x8] sm:$0xff] %vm316_vm1, %v760_v40  ;;  %v758_v57 = vmul.f32 %v755_v54, %v752_v45  ;;  %v793_v58 = vsel %vm316_vm1, %v790_v55, 0.0  ;;  %v788_v59 = vsub.f32 %v760_v40, %v1600_v9  ;;  %v965_v9 = vadd.f32 0.5, %v961_v1 }
 0x581   : > { %794 = vadd.xlane.f32.xlu1 %v793_v58 }
 0x582   : > { %v761_v60 = vsub.f32 %v1606_v10, %v758_v57  ;;  %v791_v61 = vmul.f32 %v788_v59, %v788_v59  ;;  %v1287_v28 = vtrunc.f32 %v965_v9 }
 0x584   : > { %764 = vst.msk [vmem:[%s304_s23 + $0x10] sm:$0xff] %vm316_vm1, %v761_v60  ;;  %v796_v8 = vsel %vm316_vm1, %v791_v61, 0.0  ;;  %v789_v62 = vsub.f32 %v761_v60, %v1606_v10  ;;  %v1288_v4 = vcvt.f32.s32 %v1287_v28  ;;  %v1252_v10 = vpop.f32.mrb[7].mxu0 }
 0x585   : > { %797 = vadd.xlane.f32.xlu0 %v796_v8 }
 0x586   : > { %v792_v63 = vmul.f32 %v789_v62, %v789_v62  ;;  %968 = vst.msk [vmem:[%s282_s29] sm:$0x1] %vm967_vm9, %v1288_v4 }
 0x588   : > { %v799_v0 = vsel %vm316_vm1, %v792_v63, 0.0 }
 0x589   : > { %800 = vadd.xlane.f32.xlu1 %v799_v0 }
 0x58a   : > { %1387 = shalt.err (!%p1384_p3)
}
 0x58b   : > { %s1388_s23 = scalar_lea.hbm %s1770_s15, 16  ;;  %s1392_s14 = scalar_lea.hbm %s1851_s5, 32 }
 0x58c   : > { %p1389_p4 = scmp.ne.s32.totalorder %s1770_s15, %s1388_s23  ;;  %p1393_p9 = scmp.lt.u32.totalorder %s1770_s15, %s1851_s5 }
 0x58d   : > { %p1394_p10 = scmp.lt.u32.totalorder %s1392_s14, %s1388_s23  ;;  %p1396_p12 = scmp.lt.u32.totalorder %s1388_s23, %s1770_s15 }
 0x58e   : > { %p1390_p7 = pnand %p1389_p4, %p1555_p5 }
 0x58f   : > { %p1395_p11 = por %p1394_p10, %p1393_p9 }
 0x590   : > { %p1391_p8 = pneg %p1390_p7 }
 0x591   : > { %p1397_p13 = por %p1396_p12, %p1395_p11 }
 0x593   : > { %p1398_p0 = pnand %p1397_p13, %p1391_p8 }
 0x595   : > { %1401 = shalt.err (!%p1398_p0)
}
 0x596   : > { %1289 = dma.vmem_to_hbm [thread:$0]  (%p1555_p5), %s999_s8, 16, %s1770_s15, %s975_s16  }
 0x597   : > { %s1795_s29 = scalar_lea.hbm %s1852_s6, %s1172_s22  ;;  %s1011_s13 = sshll.u32 %s288_s9, 4  ;;  %s1012_s13 = int_to_ptr.vmem [resolvable:$true] %s1011_s13 }
 0x598   : > { %s979_s23 = scalar_lea.sflag [#allocation5], %s1758_s21  ;;  %s1402_s14 = scalar_lea.vmem %s1012_s13, 16 }
 0x599   : > { %p1403_p1 = scmp.ne.s32.totalorder %s1012_s13, %s1402_s14  ;;  %s1476_s18 = smov [#allocation4]  }
 0x59a   : > { %s1406_s19 = sshll.u32 %s1476_s18, 4  ;;  %s1407_s19 = int_to_ptr.vmem [resolvable:$false] %s1406_s19 }
 0x59b   : > { %p1404_p2 = pnand %p1403_p1, %p1555_p5  ;;  %s1408_s0 = scalar_lea.vmem %s1407_s19, 32 }
 0x59c   : > { %p1409_p4 = scmp.lt.s32.totalorder %s1012_s13, %s1407_s19  ;;  %p1410_p7 = scmp.lt.s32.totalorder %s1408_s0, %s1402_s14 }
 0x59d   : > { %p1405_p3 = pneg %p1404_p2 }
 0x59e   : > { %p1411_p8 = por %p1410_p7, %p1409_p4 }
 0x5a0   : > { %p1412_p9 = pnand %p1411_p8, %p1405_p3 }
 0x5a2   : > { %1415 = shalt.err (!%p1412_p9)
}
 0x5a3   : > { %s1416_s21 = scalar_lea.hbm %s1795_s29, 16  ;;  %s1420_s9 = scalar_lea.hbm %s1852_s6, 32 }
 0x5a4   : > { %p1417_p10 = scmp.ne.s32.totalorder %s1795_s29, %s1416_s21  ;;  %p1421_p13 = scmp.lt.u32.totalorder %s1795_s29, %s1852_s6 }
 0x5a5   : > { %p1422_p0 = scmp.lt.u32.totalorder %s1420_s9, %s1416_s21  ;;  %p1424_p2 = scmp.lt.u32.totalorder %s1416_s21, %s1795_s29 }
 0x5a6   : > { %p1418_p11 = pnand %p1417_p10, %p1555_p5 }
 0x5a7   : > { %p1423_p1 = por %p1422_p0, %p1421_p13 }
 0x5a8   : > { %p1419_p12 = pneg %p1418_p11 }
 0x5a9   : > { %p1425_p3 = por %p1424_p2, %p1423_p1 }
 0x5ab   : > { %p1426_p4 = pnand %p1425_p3, %p1419_p12 }
 0x5ad   : > { %1429 = shalt.err (!%p1426_p4)
}
 0x5ae   : > { %1290 = dma.vmem_to_hbm [thread:$0]  (%p1555_p5), %s1012_s13, 16, %s1795_s29, %s979_s23   ;;  %v767_v7 = vshrl.u32 %v419_v27, 7  ;;  %vm813_vm12 = vcmask 0  }
 0x5af   : > { %p306_p5 = scmp.lt.s32.totalorder %s1538_s28, 1 }
 0x5b0   : > { %v768_v11 = vadd.s32 8, %v767_v7  ;;  %v769_v13 = vadd.s32 16, %v767_v7  ;;  %v771_v14 = vadd.s32 %v1723_v56, %v767_v7 }
 0x5b1   : > { %s1865_s28 = smov (!%p306_p5, %s1538_s28), 1 }
 0x5b2   : > { %v772_v12 = vadd.s32 %v1723_v56, %v768_v11  ;;  %v773_v15 = vadd.s32 %v1723_v56, %v769_v13  ;;  %vm774_vm10 = vcmp.lt.s32.totalorder %v771_v14, 40  ;;  %s308_s17 = scalar_lea.vmem %s1853_s7, %s1865_s28 }
 0x5b3   : > { %v1160_v17 = vsel %vm774_vm10, 1.0, %v1472_v6 }
 0x5b4   : > { %vm775_vm1 = vcmp.lt.s32.totalorder %v772_v12, 40  ;;  %vm776_vm11 = vcmp.lt.s32.totalorder %v773_v15, 40 }
 0x5b5   : > { %v1161_v16 = vsel %vm775_vm1, 1.0, %v1472_v6  ;;  %v1162_v3 = vsel %vm776_vm11, 1.0, %v1472_v6 }
 0x60e   : > { %v795_v18 = vpop.xlane.xlu1 %794 }
 0x60f   : > { %v802_v20 = vmul.f32 %v1160_v17, %v795_v18 }
 0x612   : > { %v798_v19 = vpop.xlane.xlu0 %797 }
 0x613   : > { %v803_v27 = vmul.f32 %v1161_v16, %v798_v19 }
 0x615   : > { %v805_v22 = vadd.f32 %v803_v27, %v802_v20 }
 0x616   : > { %v801_v21 = vpop.xlane.xlu1 %800 }
 0x617   : > { %v804_v23 = vmul.f32 %v1162_v3, %v801_v21 }
 0x619   : > { %v806_v24 = vadd.f32 %v805_v22, %v804_v23 }
 0x61b   : > { %v807_v25 = vrot.slane %v806_v24, 4 }
 0x61d   : > { %v808_v56 = vadd.f32 %v807_v25, %v806_v24 }
 0x61f   : > { %v809_v26 = vrot.slane %v808_v56, 2 }
 0x621   : > { %v810_v29 = vadd.f32 %v809_v26, %v808_v56 }
 0x623   : > { %v811_v30 = vrot.slane %v810_v29, 1 }
 0x625   : > { %v812_v31 = vadd.f32 %v811_v30, %v810_v29 }
 0x627   : > { %814 = vst.msk [vmem:[%s308_s17] sm:$0x1] %vm813_vm12, %v812_v31 }
 0x628 PF: > { %p1300_p7 = scmp.ge.s32.totalorder %s1468_s27, 2  ;;  %s1034_s20 = sand.u32 1, %s1456_s24  }
 0x629   : > { %s1035_s29 = scalar_lea.sflag [#allocation3], %s1034_s20 }
 0x62a   : > { %p1294_p8 = pnand %p1300_p7, %p1559_p6 }
 0x62c   : > { %1447 = dma.done.wait (!%p1294_p8), %s1035_s29, 16  }
 0x62d   : > { %1449 = vsyncadd (!%p1294_p8), %s1035_s29, 4294967280  ;;  %s1043_s13 = scalar_lea.sflag [#allocation5], %s1034_s20 }
 0x62e   : > { %1451 = dma.done.wait (!%p1294_p8), %s1043_s13, 16  }
 0x62f   : > { %1453 = vsyncadd (!%p1294_p8), %s1043_s13, 4294967280  ;;  %p21_p9 = scmp.ge.s32.totalorder %s1542_s30, 4   ;;  %s1858_s24 = smov %s1460_s25 }
 0x630   : > { %s1859_s25 = smov %s1464_s26  ;;  %s1860_s26 = smov %s1553_s10 }
 0x631   : > { %s1861_s27 = smov %s1542_s30  ;;  %23 = sbr.rel (!%p21_p9) target bundleno = 7 (0x7), region = 112 }
 0x638   :  { %1053 = vsyncpa [#allocation3], 1 }
 0x639   :  { %1055 = vsyncpa [#allocation3 + $0x1], 1 }
 0x63a   :  { %1056 = vsyncpa [#allocation5], 1 }
 0x63b   :  { %1058 = vsyncpa [#allocation5 + $0x1], 1 }

// kernel: tpu_custom_call.1
= control target key start
LH: loop header
LB: loop body
LE: loop exit
PB: predicated region body
PF: predicated region fallthrough
CT: control target
= control target key end

     0   :  { %s1846_s0 = inlined_call_operand.vmem [shape: f32[48,32], index: 0, kind: input, shape index: {}]   ;;  %s1847_s1 = inlined_call_operand.vmem [shape: f32[32,64], index: 1, kind: input, shape index: {}]   ;;  %s1848_s2 = inlined_call_operand.vmem [shape: f32[64,32], index: 2, kind: input, shape index: {}]   ;;  %s1849_s3 = inlined_call_operand.vmem [shape: f32[1,64], index: 3, kind: input, shape index: {}]   ;;  %s1850_s4 = inlined_call_operand.vmem [shape: f32[48,32], index: 4, kind: output, shape index: {0}]   ;;  %s1851_s5 = inlined_call_operand.hbm [shape: s32[2,1,24], index: 5, kind: output, shape index: {1}]   ;;  %s1852_s6 = inlined_call_operand.hbm [shape: f32[2,1,64], index: 6, kind: output, shape index: {2}]   ;;  %s1853_s7 = inlined_call_operand.vmem [shape: f32[2,1,1], index: 7, kind: output, shape index: {3}]  }
   0x1   :  { %1854 = sst [smem:[#allocation8_spill]] %s1846_s0 }
   0x2   :  { %13 = vsyncpa [#allocation3], 0 }
   0x3   :  { %15 = vsyncpa [#allocation3 + $0x1], 0 }
   0x4   :  { %16 = vsyncpa [#allocation5], 0 }
   0x5   :  { %18 = vsyncpa [#allocation5 + $0x1], 0  ;;  %s1517_s24 = smov 0   ;;  %s1519_s25 = smov 0  }
   0x6   :  { %s1521_s26 = smov 0   ;;  %s1523_s27 = smov 0  }
   0x7 LB: > { %s1538_s28 = sadd.s32 4294967295, %s1468_s27   ;;  %s1141_s29 = sadd.s32 4294967294, %s1468_s27   ;;  %s1468_s27 = sphi %s1523_s27, %s1861_s27   ;;  %s1464_s26 = sphi %s1521_s26, %s1860_s26   ;;  %s1460_s25 = sphi %s1519_s25, %s1859_s25   ;;  %s1456_s24 = sphi %s1517_s24, %s1858_s24  }
   0x8   : > { %s1542_s30 = sadd.s32 1, %s1468_s27   ;;  %s146_s8 = sadd.s32 1, %s1464_s26 }
   0x9   : > { %s143_s9 = ssub.s32 %s1468_s27, %s1542_s30  ;;  %p156_p0 = scmp.ne.s32.totalorder %s1464_s26, %s1460_s25 }
   0xa   : > { %p144_p1 = scmp.eq.s32.totalorder %s143_s9, 0  ;;  %p157_p2 = scmp.eq.s32.totalorder %s1538_s28, 1 }
   0xb   : > { %p162_p3 = scmp.ne.s32.totalorder %s1460_s25, %s1456_s24  ;;  %p163_p4 = scmp.eq.s32.totalorder %s1141_s29, 1 }
   0xc   : > { %s1553_s10 = scalar_select %p144_p1, %s1464_s26, %s146_s8  }
   0xd   : > { %p1555_p5 = por %p157_p2, %p156_p0  ;;  %p1559_p6 = por %p163_p4, %p162_p3 }
   0xe   : > { %p1144_p7 = scmp.ge.s32.totalorder %s1468_s27, 1  ;;  %p251_p8 = scmp.lt.s32.totalorder %s1468_s27, 3 }
  0x10   : > { %p252_p9 = pnand %p1144_p7, %p251_p8 }
  0x11   : > { %v312_v0 = vld [vmem:[%s1847_s1] sm:$0xff] (!%p252_p9)  ;;  %v313_v1 = vld [vmem:[%s1847_s1 + $0x8] sm:$0xff] (!%p252_p9)  ;;  %v314_v2 = vld [vmem:[%s1847_s1 + $0x10] sm:$0xff] (!%p252_p9)  ;;  %v1470_v3 = vmov (!%p252_p9), 0.0|0.0   ;;  %vm1471_vm0 = vmmov (!%p252_p9), 0   ;;  %v1472_v6 = vmov (!%p252_p9), 0.0   ;;  %v419_v27 = vlaneseq (!%p252_p9) }
  0x12   : > { %255 = sbr.rel (%p252_p9) target bundleno = 1576 (0x628), region = 36  ;;  %1262 = vmatprep.subr.bf16.mxu0 (!%p252_p9), %v1470_v3  ;;  %v1263_v4 = vpack.c.bf16 (!%p252_p9), %v313_v1, %v312_v0  ;;  %v315_v5 = vld [vmem:[%s1847_s1 + $0x18] sm:$0xff] (!%p252_p9)  ;;  %1210 = vmatprep.mubr.msk.f32.mxu0 (!%p252_p9), %vm1471_vm0, %v1472_v6  ;;  %vm316_vm1 = vcmask (!%p252_p9), 261120   ;;  %s1857_s0 = sld [smem:[#allocation8_spill]] (!%p252_p9)  ;;  %v1150_v12 = vld [vmem:[%s1849_s3] ss:$0 sm:$0xff] (!%p252_p9) }
  0x13   : > { %s294_s21 = smul.u32 (!%p252_p9), 3, %s1538_s28  ;;  %1268 = vmatprep.subr.bf16.mxu1 (!%p252_p9), %v1470_v3  ;;  %1235 = vmatprep.mubr.msk.f32.mxu1 (!%p252_p9), %vm1471_vm0, %v1472_v6  ;;  %v1266_v7 = vpack.c.bf16 (!%p252_p9), %v315_v5, %v314_v2  ;;  %vm421_vm2 = vcmask (!%p252_p9), 523264   ;;  %v1619_v28 = vand.u32 (!%p252_p9), 127, %v419_v27  ;;  %v491_v44 = vld [vmem:[%s1848_s2] sm:$0xff] (!%p252_p9)  ;;  %v492_v45 = vld [vmem:[%s1848_s2 + $0x8] sm:$0xff] (!%p252_p9)  ;;  %v493_v46 = vld [vmem:[%s1848_s2 + $0x10] sm:$0xff] (!%p252_p9) }
  0x14   : > { %1264 = vmatpush3.bf16.msra.mxu0 (!%p252_p9), %v1263_v4  ;;  %v1269_v47 = vpack.c.bf16 (!%p252_p9), %v492_v45, %v491_v44  ;;  %v494_v48 = vld [vmem:[%s1848_s2 + $0x18] sm:$0xff] (!%p252_p9)  ;;  %v495_v50 = vld [vmem:[%s1848_s2 + $0x20] sm:$0xff] (!%p252_p9)  ;;  %v496_v51 = vld [vmem:[%s1848_s2 + $0x28] sm:$0xff] (!%p252_p9)  ;;  %s765_s18 = smul.u32 (!%p252_p9), 24, %s1538_s28 }
  0x15   : > { %p295_p10 = scmp.lt.s32.totalorder (!%p252_p9), %s294_s21, 5  ;;  %1265 = vmatprep.subr.bf16.mxu0 (!%p252_p9), %v1470_v3  ;;  %v1272_v49 = vpack.c.bf16 (!%p252_p9), %v494_v48, %v493_v46  ;;  %v1275_v52 = vpack.c.bf16 (!%p252_p9), %v496_v51, %v495_v50  ;;  %v497_v1 = vld [vmem:[%s1848_s2 + $0x30] sm:$0xff] (!%p252_p9)  ;;  %v498_v2 = vld [vmem:[%s1848_s2 + $0x38] sm:$0xff] (!%p252_p9)  ;;  %vm1285_vm11 = vmpackc.low (!%p252_p9), %vm421_vm2, %vm421_vm2 }
  0x16   : > { %1270 = vmatpush3.bf16.msra.mxu1 (!%p252_p9), %v1269_v47  ;;  %v1278_v4 = vpack.c.bf16 (!%p252_p9), %v498_v2, %v497_v1 }
  0x17   : > { %1271 = vmatprep.subr.bf16.mxu1 (!%p252_p9), %v1470_v3 }
  0x18   : > { %1267 = vmatpush3.bf16.msra.mxu0 (!%p252_p9), %v1266_v7 }
  0x19   : > { %s1863_s21 = smov (!%p295_p10, %s294_s21), 5  ;;  %1280 = vmatprep.subr.bf16.mxu0 %v1470_v3 }
  0x1a   : > { %s1145_s22 = sshll.u32 %s1863_s21, 3  ;;  %1273 = vmatpush3.bf16.msra.mxu1 %v1272_v49  ;;  %s1758_s21 = sand.u32 1, %s1460_s25  }
  0x1b   : > { %s298_s8 = scalar_lea.vmem %s1857_s0, %s1145_s22  ;;  %1274 = vmatprep.subr.bf16.mxu1 %v1470_v3  ;;  %s304_s23 = scalar_lea.vmem %s1850_s4, %s1145_s22 }
  0x1c   : > { %v1594_v8 = vld [vmem:[%s298_s8] sm:$0xff]  ;;  %v1600_v9 = vld [vmem:[%s298_s8 + $0x8] sm:$0xff]  ;;  %v1606_v10 = vld [vmem:[%s298_s8 + $0x10] sm:$0xff]  ;;  %s1172_s22 = sshll.u32 %s1538_s28, 4  ;;  %s282_s29 = scalar_lea.vmem [#allocation2], %s1758_s21 }
  0x1d   : > { %1211 = vmatmul.mubr.msk.f32.vlgmr.msra.gmra.mrb[0].mxu0 %vm316_vm1, %v1594_v8  ;;  %v588_v5 = vmul.f32 %v1594_v8, %v1594_v8  ;;  %v589_v7 = vmul.f32 %v1600_v9, %v1600_v9  ;;  %s998_s8 = sshll.u32 %s282_s29, 4  ;;  %s288_s9 = scalar_lea.vmem [#allocation4], %s1758_s21  ;;  %s999_s8 = int_to_ptr.vmem [resolvable:$true] %s998_s8 }
  0x1e   : > { %1213 = vmatprep.mubr.msk.f32.mxu0 %vm1471_vm0, %v1472_v6  ;;  %1276 = vmatpush3.bf16.msra.mxu1 %v1275_v52  ;;  %s1770_s15 = scalar_lea.hbm %s1851_s5, %s1172_s22  ;;  %s975_s16 = scalar_lea.sflag [#allocation3], %s1758_s21 }
  0x1f   : > { %1277 = vmatprep.subr.bf16.mxu1 %v1470_v3  ;;  %s1374_s17 = scalar_lea.vmem %s999_s8, 16 }
  0x20   : > { %p1375_p11 = scmp.ne.s32.totalorder %s999_s8, %s1374_s17 }
  0x21   : > { %1214 = vmatmul.mubr.msk.f32.gmra.mrb[2].mxu0 %vm316_vm1, %v1600_v9 }
  0x22   : > { %1216 = vmatprep.mubr.msk.f32.mxu0 %vm1471_vm0, %v1472_v6  ;;  %1279 = vmatpush3.bf16.msra.mxu1 %v1278_v4  ;;  %p1376_p12 = pnand %p1375_p11, %p1555_p5 }
  0x23   : > { %1283 = vmatprep.subr.bf16.mxu1 %v1470_v3 }
  0x24   : > { %p1377_p13 = pneg %p1376_p12 }
  0x25   : > { %1217 = vmatmul.mubr.msk.f32.gmra.mrb[4].mxu0 %vm316_vm1, %v1606_v10 }
  0x26   : > { %1250 = vmatprep.mubr.msk.f32.mxu0 %vm1471_vm0, %v1472_v6 }
  0xf0   : > { %v392_v11 = vpop.f32.mrb[0].mxu0 }
  0xf1   : > { %v407_v13 = vmul.f32 2.0, %v392_v11  ;;  %v1212_v14 = vpop.f32.mrb[1].mxu0  ;;  %v591_v11 = vsel %vm316_vm1, %v588_v5, 0.0 }
  0xf3   : > { %v416_v15 = vsub.f32 %v1150_v12, %v407_v13 }
  0xf4   : > { %v397_v16 = vpop.f32.mrb[2].mxu0 }
  0xf5   : > { %v408_v17 = vmul.f32 2.0, %v397_v16  ;;  %v1215_v18 = vpop.f32.mrb[3].mxu0  ;;  %v422_v19 = vsel %vm421_vm2, %v416_v15, inf }
  0xf6   : > { %423 = vmin.xlane.f32.xlu0 %v422_v19 }
  0xf7   : > { %v417_v20 = vsub.f32 %v1150_v12, %v408_v17 }
  0xf8   : > { %v402_v21 = vpop.f32.mrb[4].mxu0 }
  0xf9   : > { %v409_v22 = vmul.f32 2.0, %v402_v21  ;;  %v1218_v23 = vpop.f32.mrb[5].mxu0  ;;  %v425_v24 = vsel %vm421_vm2, %v417_v20, inf }
  0xfa   : > { %426 = vmin.xlane.f32.xlu0 %v425_v24 }
  0xfb   : > { %v418_v25 = vsub.f32 %v1150_v12, %v409_v22  ;;  %v594_v12 = vsel %vm316_vm1, %v589_v7, 0.0 }
  0xfd   : > { %v428_v26 = vsel %vm421_vm2, %v418_v25, inf }
  0xfe   : > { %429 = vmin.xlane.f32.xlu1 %v428_v26 }
 0x183   : > { %v424_v29 = vpop.xlane.xlu0 %423 }
 0x184   : > { %vm431_vm3 = vcmp.le.f32.partialorder %v416_v15, %v424_v29 }
 0x185   : > { %v434_v30 = vsel %vm431_vm3, %v1619_v28, 64 }
 0x186   : > { %v437_v31 = vsel %vm421_vm2, %v434_v30, 2147483647 }
 0x187   : > { %v427_v32 = vpop.xlane.xlu0 %426  ;;  %v439_v33 = vshra.s32 %v437_v31, 16  ;;  %v438_v53 = vand.u32 65535, %v437_v31 }
 0x188   : > { %vm432_vm4 = vcmp.le.f32.partialorder %v417_v20, %v427_v32  ;;  %v1473_v32 = vmov 1.0|1.0  }
 0x189   : > { %v435_v34 = vsel %vm432_vm4, %v1619_v28, 64  ;;  %v441_v35 = vcvt.s32.f32 %v439_v33  ;;  %v440_v55 = vcvt.s32.f32 %v438_v53 }
 0x18a   : > { %v452_v36 = vsel %vm421_vm2, %v435_v34, 2147483647  ;;  %v1474_v34 = vmov 1.0  }
 0x18b   : > { %442 = vmin.xlane.f32.xlu1 %v441_v35  ;;  %v430_v37 = vpop.xlane.xlu1 %429  ;;  %v454_v38 = vshra.s32 %v452_v36, 16  ;;  %v453_v56 = vand.u32 65535, %v452_v36 }
 0x18c   : > { %vm433_vm5 = vcmp.le.f32.partialorder %v418_v25, %v430_v37 }
 0x18d   : > { %v436_v39 = vsel %vm433_vm5, %v1619_v28, 64  ;;  %v456_v40 = vcvt.s32.f32 %v454_v38  ;;  %v455_v59 = vcvt.s32.f32 %v453_v56  ;;  %v590_v38 = vmul.f32 %v1606_v10, %v1606_v10 }
 0x18e   : > { %v467_v41 = vsel %vm421_vm2, %v436_v39, 2147483647 }
 0x18f   : > { %457 = vmin.xlane.f32.xlu0 %v456_v40  ;;  %v469_v42 = vshra.s32 %v467_v41, 16  ;;  %v468_v60 = vand.u32 65535, %v467_v41 }
 0x191   : > { %v471_v43 = vcvt.s32.f32 %v469_v42  ;;  %v470_v63 = vcvt.s32.f32 %v468_v60 }
 0x193   : > { %472 = vmin.xlane.f32.xlu1 %v471_v43 }
 0x218   : > { %v443_v54 = vpop.xlane.xlu1 %442 }
 0x219   : > { %vm444_vm6 = vcmp.eq.f32.partialorder %v441_v35, %v443_v54  ;;  %v449_v13 = vcvt.f32.s32 %v443_v54 }
 0x21a   : > { %v445_v57 = vsel %vm444_vm6, %v440_v55, inf }
 0x21b   : > { %446 = vmin.xlane.f32.xlu0 %v445_v57  ;;  %v450_v15 = vshll.u32 %v449_v13, 16 }
 0x21c   : > { %v458_v58 = vpop.xlane.xlu0 %457 }
 0x21d   : > { %vm459_vm7 = vcmp.eq.f32.partialorder %v456_v40, %v458_v58  ;;  %v464_v16 = vcvt.f32.s32 %v458_v58 }
 0x21e   : > { %v460_v61 = vsel %vm459_vm7, %v455_v59, inf }
 0x21f   : > { %461 = vmin.xlane.f32.xlu1 %v460_v61  ;;  %v465_v3 = vshll.u32 %v464_v16, 16 }
 0x220   : > { %v473_v62 = vpop.xlane.xlu1 %472 }
 0x221   : > { %vm474_vm8 = vcmp.eq.f32.partialorder %v471_v43, %v473_v62  ;;  %v479_v20 = vcvt.f32.s32 %v473_v62  ;;  %v597_v43 = vsel %vm316_vm1, %v590_v38, 0.0 }
 0x222   : > { %v475_v0 = vsel %vm474_vm8, %v470_v63, inf }
 0x223   : > { %476 = vmin.xlane.f32.xlu0 %v475_v0  ;;  %592 = vadd.xlane.f32.xlu1 %v591_v11  ;;  %v480_v25 = vshll.u32 %v479_v20, 16 }
 0x227   : > { %595 = vadd.xlane.f32.xlu0 %v594_v12 }
 0x2a8   : > { %v447_v14 = vpop.xlane.xlu0 %446 }
 0x2a9   : > { %v448_v17 = vcvt.f32.s32 %v447_v14 }
 0x2ab   : > { %v451_v18 = vadd.s32 %v450_v15, %v448_v17 }
 0x2ac   : > { %v462_v19 = vpop.xlane.xlu1 %461 }
 0x2ad   : > { %v463_v21 = vcvt.f32.s32 %v462_v19  ;;  %vm482_vm9 = vcmp.eq.s32.totalorder %v1619_v28, %v451_v18 }
 0x2ae   : > { %v1151_v22 = vsel %vm482_vm9, 1.0, %v1472_v6 }
 0x2af   : > { %v466_v23 = vadd.s32 %v465_v3, %v463_v21  ;;  %1236 = vmatmul.mubr.msk.f32.vlgmr.msra.gmra.mrb[0].mxu1 %vm421_vm2, %v1151_v22 }
 0x2b0   : > { %v477_v24 = vpop.xlane.xlu0 %476  ;;  %1238 = vmatprep.mubr.msk.f32.mxu1 %vm1471_vm0, %v1472_v6  ;;  %v593_v49 = vpop.xlane.xlu1 %592 }
 0x2b1   : > { %v478_v26 = vcvt.f32.s32 %v477_v24  ;;  %vm483_vm10 = vcmp.eq.s32.totalorder %v1619_v28, %v466_v23  ;;  %1338 = vrsqrt.f32 %v593_v49  ;;  %vm614_vm14 = vcmp.eq.f32.partialorder %v593_v49, inf }
 0x2b2   : > { %v1152_v29 = vsel %vm483_vm10, 1.0, %v1472_v6  ;;  %vm1281_vm12 = vmpackc.low %vm483_vm10, %vm482_vm9  ;;  %v617_v57 = vand.u32 2147483648, %v593_v49  ;;  %vm616_vm15 = vcmp.eq.f32.partialorder %v593_v49, 0.0 }
 0x2b3   : > { %v481_v30 = vadd.s32 %v480_v25, %v478_v26  ;;  %1239 = vmatmul.mubr.msk.f32.gmra.mrb[2].mxu1 %vm421_vm2, %v1152_v29  ;;  %v1284_v31 = vpack.c.bf16 %v1152_v29, %v1151_v22  ;;  %1282 = vmatpush3.bf16.msk.msra.mxu0 %vm1281_vm12, %v1473_v32  ;;  %vm815_vm12 = vcmask 195584  }
 0x2b4   : > { %1241 = vmatprep.mubr.msk.f32.mxu1 %vm1471_vm0, %v1472_v6  ;;  %1248 = vmatprep.subr.mxu0 %v1472_v6  ;;  %v596_v50 = vpop.xlane.xlu0 %595 }
 0x2b5   : > { %1286 = vmatpush3.bf16.xpose.msk.msra.mxu1 %vm1285_vm11, %v1284_v31  ;;  %vm484_vm13 = vcmp.eq.s32.totalorder %v1619_v28, %v481_v30  ;;  %1340 = vrsqrt.f32 %v596_v50  ;;  %v624_v61 = vand.u32 2147483648, %v596_v50  ;;  %vm623_vm3 = vcmp.eq.f32.partialorder %v596_v50, 0.0 }
 0x2b6   : > { %v1153_v33 = vsel %vm484_vm13, 1.0, %v1472_v6  ;;  %1257 = vmatprep.subr.mxu1 %v1472_v6 }
 0x2b7   : > { %1242 = vmatmul.mubr.msk.f32.gmra.mrb[4].mxu1 %vm421_vm2, %v1153_v33  ;;  %1249 = vmatpush3.msk.msra.mxu0 %vm484_vm13, %v1474_v34 }
 0x2b8   : > { %1259 = vmatprep.mubr.msk.f32.mxu1 %vm1471_vm0, %v1472_v6  ;;  %vm621_vm0 = vcmp.eq.f32.partialorder %v596_v50, inf }
 0x2bb   : > { %v1339_v51 = vpop.eup %1338 }
 0x2bc   : > { %v613_v53 = vmul.f32 %v1339_v51, %v593_v49 }
 0x2bd   : > { %1258 = vmatpush3.xpose.msk.msra.mxu1 %vm421_vm2, %v1153_v33 }
 0x2be   : > { %v615_v59 = vsel %vm614_vm14, %v593_v49, %v613_v53 }
 0x2bf   : > { %v1341_v54 = vpop.eup %1340  ;;  %v618_v62 = vsel %vm616_vm15, %v617_v57, %v615_v59 }
 0x2c0   : > { %v620_v58 = vmul.f32 %v1341_v54, %v596_v50  ;;  %v633_v1 = vmax.f32 %v618_v62, 1e-12 }
 0x2c2   : > { %v622_v63 = vsel %vm621_vm0, %v596_v50, %v620_v58 }
 0x2c3   : > { %v625_v4 = vsel %vm623_vm3, %v624_v61, %v622_v63 }
 0x2c4   : > { %v634_v14 = vmax.f32 %v625_v4, 1e-12 }
 0x382   : > { %v1681_v35 = vpop.f32.mrb[0].mxu1 }
 0x383   : > { %v600_v36 = vmul.f32 %v1681_v35, %v1681_v35  ;;  %v1237_v37 = vpop.f32.mrb[1].mxu1 }
 0x385   : > { %v603_v39 = vsel %vm316_vm1, %v600_v36, 0.0 }
 0x386   : > { %604 = vadd.xlane.f32.xlu1 %v603_v39  ;;  %v1688_v40 = vpop.f32.mrb[2].mxu1 }
 0x387   : > { %v601_v41 = vmul.f32 %v1688_v40, %v1688_v40  ;;  %v1240_v42 = vpop.f32.mrb[3].mxu1 }
 0x389   : > { %v606_v44 = vsel %vm316_vm1, %v601_v41, 0.0 }
 0x38a   : > { %598 = vadd.xlane.f32.xlu1 %v597_v43  ;;  %607 = vadd.xlane.f32.xlu0 %v606_v44  ;;  %v1694_v45 = vpop.f32.mrb[4].mxu1 }
 0x38b   : > { %v602_v46 = vmul.f32 %v1694_v45, %v1694_v45  ;;  %v1243_v47 = vpop.f32.mrb[5].mxu1 }
 0x38d   : > { %v609_v48 = vsel %vm316_vm1, %v602_v46, 0.0 }
 0x38e   : > { %610 = vadd.xlane.f32.xlu0 %v609_v48 }
 0x413   : > { %v605_v52 = vpop.xlane.xlu1 %604 }
 0x414   : > { %1342 = vrsqrt.f32 %v605_v52  ;;  %vm647_vm4 = vcmp.eq.f32.partialorder %v605_v52, inf  ;;  %v650_v5 = vand.u32 2147483648, %v605_v52  ;;  %vm649_vm5 = vcmp.eq.f32.partialorder %v605_v52, 0.0 }
 0x417   : > { %v608_v55 = vpop.xlane.xlu0 %607  ;;  %v599_v56 = vpop.xlane.xlu1 %598 }
 0x418   : > { %1344 = vrsqrt.f32 %v608_v55  ;;  %vm654_vm6 = vcmp.eq.f32.partialorder %v608_v55, inf  ;;  %vm656_vm7 = vcmp.eq.f32.partialorder %v608_v55, 0.0  ;;  %v657_v17 = vand.u32 2147483648, %v608_v55 }
 0x419   : > { %1346 = vrsqrt.f32 %v599_v56  ;;  %vm628_vm8 = vcmp.eq.f32.partialorder %v599_v56, inf  ;;  %v631_v3 = vand.u32 2147483648, %v599_v56  ;;  %vm630_vm9 = vcmp.eq.f32.partialorder %v599_v56, 0.0 }
 0x41b   : > { %v611_v60 = vpop.xlane.xlu0 %610 }
 0x41c   : > { %1348 = vrsqrt.f32 %v611_v60  ;;  %vm661_vm10 = vcmp.eq.f32.partialorder %v611_v60, inf  ;;  %v664_v29 = vand.u32 2147483648, %v611_v60  ;;  %vm663_vm11 = vcmp.eq.f32.partialorder %v611_v60, 0.0 }
 0x41d   : > { %1350 = vrcp.f32 %v633_v1 }
 0x41e   : > { %v1343_v0 = vpop.eup %1342 }
 0x41f   : > { %v646_v2 = vmul.f32 %v1343_v0, %v605_v52 }
 0x421   : > { %v648_v7 = vsel %vm647_vm4, %v605_v52, %v646_v2 }
 0x422   : > { %v1345_v11 = vpop.eup %1344  ;;  %v651_v12 = vsel %vm649_vm5, %v650_v5, %v648_v7 }
 0x423   : > { %v1347_v13 = vpop.eup %1346  ;;  %v666_v15 = vmax.f32 %v651_v12, 1e-12  ;;  %v653_v16 = vmul.f32 %v1345_v11, %v608_v55 }
 0x424   : > { %v627_v18 = vmul.f32 %v1347_v13, %v599_v56 }
 0x425   : > { %1352 = vrcp.f32 %v666_v15  ;;  %v655_v19 = vsel %vm654_vm6, %v608_v55, %v653_v16  ;;  %v891_v55 = vcvt.s32.f32 %v1619_v28 }
 0x426   : > { %v1349_v20 = vpop.eup %1348  ;;  %v658_v21 = vsel %vm656_vm7, %v657_v17, %v655_v19  ;;  %v629_v22 = vsel %vm628_vm8, %v599_v56, %v627_v18  ;;  %1354 = vrcp.f32 %v634_v14  ;;  %v1723_v56 = vstv %s765_s18  ;;  %s1475_s18 = smov [#allocation2]  }
 0x427   : > { %v667_v23 = vmax.f32 %v658_v21, 1e-12  ;;  %v632_v24 = vsel %vm630_vm9, %v631_v3, %v629_v22  ;;  %v660_v25 = vmul.f32 %v1349_v20, %v611_v60  ;;  %v1351_v33 = vpop.eup %1350  ;;  %1260 = vmatmul.mubr.msk.f32.vlgmr.msra.gmra.mrb[6].mxu1 %vm421_vm2, %v891_v55  ;;  %vm889_vm8 = vcmask 516096   ;;  %s1378_s19 = sshll.u32 %s1475_s18, 4  ;;  %s1379_s19 = int_to_ptr.vmem [resolvable:$false] %s1378_s19 }
 0x428   : > { %v635_v26 = vmax.f32 %v632_v24, 1e-12  ;;  %v642_v36 = vmul.f32 %v1351_v33, %v1594_v8  ;;  %vm967_vm9 = vcmask 188416   ;;  %s1380_s20 = scalar_lea.vmem %s1379_s19, 32  ;;  %p1381_p0 = scmp.lt.s32.totalorder %s999_s8, %s1379_s19 }
 0x429   : > { %1356 = vrcp.f32 %v667_v23  ;;  %v662_v30 = vsel %vm661_vm10, %v611_v60, %v660_v25  ;;  %p1382_p1 = scmp.lt.s32.totalorder %s1380_s20, %s1374_s17 }
 0x42a   : > { %v665_v31 = vsel %vm663_vm11, %v664_v29, %v662_v30  ;;  %1358 = vrcp.f32 %v635_v26 }
 0x42b   : > { %v668_v32 = vmax.f32 %v665_v31, 1e-12  ;;  %p1383_p2 = por %p1382_p1, %p1381_p0 }
 0x42d   : > { %1360 = vrcp.f32 %v668_v32  ;;  %p1384_p3 = pnand %p1383_p2, %p1377_p13 }
 0x42f   : > { %v1353_v34 = vpop.eup %1352 }
 0x430   : > { %v675_v37 = vmul.f32 %v1353_v34, %v1681_v35  ;;  %v1355_v38 = vpop.eup %1354 }
 0x431   : > { %v643_v43 = vmul.f32 %v1355_v38, %v1600_v9 }
 0x432   : > { %v1701_v39 = vsub.f32 %v642_v36, %v675_v37 }
 0x433   : > { %v1357_v41 = vpop.eup %1356 }
 0x434   : > { %v681_v42 = vmul.f32 %v1701_v39, %v1701_v39  ;;  %v676_v44 = vmul.f32 %v1357_v41, %v1688_v40  ;;  %v1359_v46 = vpop.eup %1358 }
 0x435   : > { %v644_v50 = vmul.f32 %v1359_v46, %v1606_v10 }
 0x436   : > { %v684_v47 = vsel %vm316_vm1, %v681_v42, 0.0  ;;  %v1708_v48 = vsub.f32 %v643_v43, %v676_v44 }
 0x437   : > { %v1361_v49 = vpop.eup %1360  ;;  %685 = vadd.xlane.f32.xlu1 %v684_v47 }
 0x438   : > { %v682_v35 = vmul.f32 %v1708_v48, %v1708_v48  ;;  %v677_v51 = vmul.f32 %v1361_v49, %v1694_v45  ;;  %v783_v45 = vadd.s32 %v1723_v56, %v1619_v28 }
 0x43a   : > { %v687_v52 = vsel %vm316_vm1, %v682_v35, 0.0  ;;  %v1715_v53 = vsub.f32 %v644_v50, %v677_v51  ;;  %vm784_vm13 = vcmp.lt.s32.totalorder %v783_v45, 40 }
 0x43b   : > { %688 = vadd.xlane.f32.xlu0 %v687_v52  ;;  %v1163_v57 = vsel %vm784_vm13, 1.0, %v1472_v6 }
 0x43c   : > { %v683_v40 = vmul.f32 %v1715_v53, %v1715_v53  ;;  %1251 = vmatmul.mubr.msk.f32.vlgmr.msra.gmra.mrb[6].mxu0 %vm815_vm12, %v1163_v57 }
 0x43e   : > { %v690_v54 = vsel %vm316_vm1, %v683_v40, 0.0 }
 0x43f   : > { %691 = vadd.xlane.f32.xlu1 %v690_v54 }
 0x4c4   : > { %v686_v58 = vpop.xlane.xlu1 %685 }
 0x4c5   : > { %1362 = vrsqrt.f32 %v686_v58  ;;  %vm695_vm14 = vcmp.eq.f32.partialorder %v686_v58, inf  ;;  %v698_v63 = vand.u32 2147483648, %v686_v58  ;;  %vm697_vm2 = vcmp.eq.f32.partialorder %v686_v58, 0.0 }
 0x4c8   : > { %v689_v59 = vpop.xlane.xlu0 %688 }
 0x4c9   : > { %1364 = vrsqrt.f32 %v689_v59  ;;  %vm702_vm15 = vcmp.eq.f32.partialorder %v689_v59, inf  ;;  %v705_v5 = vand.u32 2147483648, %v689_v59  ;;  %vm704_vm0 = vcmp.eq.f32.partialorder %v689_v59, 0.0 }
 0x4cc   : > { %v692_v60 = vpop.xlane.xlu1 %691 }
 0x4cd   : > { %1366 = vrsqrt.f32 %v692_v60  ;;  %vm709_vm3 = vcmp.eq.f32.partialorder %v692_v60, inf  ;;  %v712_v15 = vand.u32 2147483648, %v692_v60  ;;  %vm711_vm4 = vcmp.eq.f32.partialorder %v692_v60, 0.0 }
 0x4cf   : > { %v1363_v61 = vpop.eup %1362 }
 0x4d0   : > { %v694_v62 = vmul.f32 %v1363_v61, %v686_v58 }
 0x4d2   : > { %v696_v0 = vsel %vm695_vm14, %v686_v58, %v694_v62 }
 0x4d3   : > { %v1365_v1 = vpop.eup %1364  ;;  %v699_v2 = vsel %vm697_vm2, %v698_v63, %v696_v0 }
 0x4d4   : > { %v701_v28 = vmul.f32 %v1365_v1, %v689_v59  ;;  %v723_v4 = vadd.f32 1e-08, %v699_v2  ;;  %vm714_vm5 = vcmp.gt.f32.partialorder %v699_v2, 1e-05 }
 0x4d5   : > { %v1157_v19 = vsel %vm714_vm5, 1.0, %v1472_v6 }
 0x4d6   : > { %v703_v7 = vsel %vm702_vm15, %v689_v59, %v701_v28  ;;  %1368 = vrcp.f32 %v723_v4  ;;  %v732_v21 = vsub.f32 1.0, %v1157_v19 }
 0x4d7   : > { %v1367_v11 = vpop.eup %1366  ;;  %v706_v12 = vsel %vm704_vm0, %v705_v5, %v703_v7 }
 0x4d8   : > { %v708_v13 = vmul.f32 %v1367_v11, %v692_v60  ;;  %v724_v14 = vadd.f32 1e-08, %v706_v12  ;;  %vm715_vm6 = vcmp.gt.f32.partialorder %v706_v12, 1e-05 }
 0x4d9   : > { %v1158_v22 = vsel %vm715_vm6, 1.0, %v1472_v6 }
 0x4da   : > { %v710_v16 = vsel %vm709_vm3, %v692_v60, %v708_v13  ;;  %1370 = vrcp.f32 %v724_v14  ;;  %v733_v29 = vsub.f32 1.0, %v1158_v22 }
 0x4db   : > { %v713_v17 = vsel %vm711_vm4, %v712_v15, %v710_v16 }
 0x4dc   : > { %v725_v18 = vadd.f32 1e-08, %v713_v17  ;;  %vm716_vm7 = vcmp.gt.f32.partialorder %v713_v17, 1e-05 }
 0x4dd   : > { %v1159_v30 = vsel %vm716_vm7, 1.0, %v1472_v6 }
 0x4de   : > { %1372 = vrcp.f32 %v725_v18  ;;  %v734_v38 = vsub.f32 1.0, %v1159_v30 }
 0x4e0   : > { %v1369_v3 = vpop.eup %1368 }
 0x4e1   : > { %v727_v20 = vmul.f32 %v1369_v3, %v1157_v19 }
 0x4e3   : > { %v735_v23 = vadd.f32 %v732_v21, %v727_v20 }
 0x4e4   : > { %v1371_v24 = vpop.eup %1370 }
 0x4e5   : > { %v738_v25 = vmul.f32 %v735_v23, %v1701_v39  ;;  %v729_v26 = vmul.f32 %v1371_v24, %v1158_v22 }
 0x4e7   : > { %v741_v31 = vmul.f32 %v738_v25, %v1594_v8  ;;  %v736_v32 = vadd.f32 %v733_v29, %v729_v26  ;;  %v753_v47 = vmul.f32 2.0, %v738_v25 }
 0x4e8   : > { %v1373_v33 = vpop.eup %1372 }
 0x4e9   : > { %v744_v34 = vsel %vm316_vm1, %v741_v31, 0.0  ;;  %v739_v36 = vmul.f32 %v736_v32, %v1708_v48  ;;  %v731_v37 = vmul.f32 %v1373_v33, %v1159_v30 }
 0x4ea   : > { %745 = vadd.xlane.f32.xlu0 %v744_v34 }
 0x4eb   : > { %v742_v41 = vmul.f32 %v739_v36, %v1600_v9  ;;  %v737_v42 = vadd.f32 %v734_v38, %v731_v37  ;;  %v754_v50 = vmul.f32 2.0, %v739_v36 }
 0x4ed   : > { %v747_v39 = vsel %vm316_vm1, %v742_v41, 0.0  ;;  %v740_v43 = vmul.f32 %v737_v42, %v1715_v53 }
 0x4ee   : > { %748 = vadd.xlane.f32.xlu1 %v747_v39 }
 0x4ef   : > { %v743_v44 = vmul.f32 %v740_v43, %v1606_v10  ;;  %v755_v54 = vmul.f32 2.0, %v740_v43 }
 0x4f1   : > { %v750_v46 = vsel %vm316_vm1, %v743_v44, 0.0 }
 0x4f2   : > { %751 = vadd.xlane.f32.xlu0 %v750_v46 }
 0x4fa   : > { %v961_v1 = vpop.f32.mrb[6].mxu1 }
 0x4fb   : > { %v1261_v2 = vpop.f32.mrb[7].mxu1 }
 0x50f   : > { %v885_v5 = vpop.f32.mrb[6].mxu0 }
 0x510   : > { %890 = vst.msk [vmem:[%s288_s9] sm:$0x1] %vm889_vm8, %v885_v5 }
 0x577   : > { %v746_v49 = vpop.xlane.xlu0 %745 }
 0x578   : > { %v756_v35 = vmul.f32 %v753_v47, %v746_v49 }
 0x57a   : > { %v759_v48 = vsub.f32 %v1594_v8, %v756_v35 }
 0x57b   : > { %v749_v51 = vpop.xlane.xlu1 %748 }
 0x57c   : > { %762 = vst.msk [vmem:[%s304_s23] sm:$0xff] %vm316_vm1, %v759_v48  ;;  %v757_v52 = vmul.f32 %v754_v50, %v749_v51  ;;  %v787_v53 = vsub.f32 %v759_v48, %v1594_v8 }
 0x57e   : > { %v760_v40 = vsub.f32 %v1600_v9, %v757_v52  ;;  %v790_v55 = vmul.f32 %v787_v53, %v787_v53 }
 0x57f   : > { %v752_v45 = vpop.xlane.xlu0 %751 }
 0x580   : > { %763 = vst.msk [vmem:[%s304_s23 + $0x8] sm:$0xff] %vm316_vm1, %v760_v40  ;;  %v758_v57 = vmul.f32 %v755_v54, %v752_v45  ;;  %v793_v58 = vsel %vm316_vm1, %v790_v55, 0.0  ;;  %v788_v59 = vsub.f32 %v760_v40, %v1600_v9  ;;  %v965_v9 = vadd.f32 0.5, %v961_v1 }
 0x581   : > { %794 = vadd.xlane.f32.xlu1 %v793_v58 }
 0x582   : > { %v761_v60 = vsub.f32 %v1606_v10, %v758_v57  ;;  %v791_v61 = vmul.f32 %v788_v59, %v788_v59  ;;  %v1287_v28 = vtrunc.f32 %v965_v9 }
 0x584   : > { %764 = vst.msk [vmem:[%s304_s23 + $0x10] sm:$0xff] %vm316_vm1, %v761_v60  ;;  %v796_v8 = vsel %vm316_vm1, %v791_v61, 0.0  ;;  %v789_v62 = vsub.f32 %v761_v60, %v1606_v10  ;;  %v1288_v4 = vcvt.f32.s32 %v1287_v28  ;;  %v1252_v10 = vpop.f32.mrb[7].mxu0 }
 0x585   : > { %797 = vadd.xlane.f32.xlu0 %v796_v8 }
 0x586   : > { %v792_v63 = vmul.f32 %v789_v62, %v789_v62  ;;  %968 = vst.msk [vmem:[%s282_s29] sm:$0x1] %vm967_vm9, %v1288_v4 }
 0x588   : > { %v799_v0 = vsel %vm316_vm1, %v792_v63, 0.0 }
 0x589   : > { %800 = vadd.xlane.f32.xlu1 %v799_v0 }
 0x58a   : > { %1387 = shalt.err (!%p1384_p3)
}
 0x58b   : > { %s1388_s23 = scalar_lea.hbm %s1770_s15, 16  ;;  %s1392_s14 = scalar_lea.hbm %s1851_s5, 32 }
 0x58c   : > { %p1389_p4 = scmp.ne.s32.totalorder %s1770_s15, %s1388_s23  ;;  %p1393_p9 = scmp.lt.u32.totalorder %s1770_s15, %s1851_s5 }
 0x58d   : > { %p1394_p10 = scmp.lt.u32.totalorder %s1392_s14, %s1388_s23  ;;  %p1396_p12 = scmp.lt.u32.totalorder %s1388_s23, %s1770_s15 }
 0x58e   : > { %p1390_p7 = pnand %p1389_p4, %p1555_p5 }
 0x58f   : > { %p1395_p11 = por %p1394_p10, %p1393_p9 }
 0x590   : > { %p1391_p8 = pneg %p1390_p7 }
 0x591   : > { %p1397_p13 = por %p1396_p12, %p1395_p11 }
 0x593   : > { %p1398_p0 = pnand %p1397_p13, %p1391_p8 }
 0x595   : > { %1401 = shalt.err (!%p1398_p0)
}
 0x596   : > { %1289 = dma.vmem_to_hbm [thread:$0]  (%p1555_p5), %s999_s8, 16, %s1770_s15, %s975_s16  }
 0x597   : > { %s1795_s29 = scalar_lea.hbm %s1852_s6, %s1172_s22  ;;  %s1011_s13 = sshll.u32 %s288_s9, 4  ;;  %s1012_s13 = int_to_ptr.vmem [resolvable:$true] %s1011_s13 }
 0x598   : > { %s979_s23 = scalar_lea.sflag [#allocation5], %s1758_s21  ;;  %s1402_s14 = scalar_lea.vmem %s1012_s13, 16 }
 0x599   : > { %p1403_p1 = scmp.ne.s32.totalorder %s1012_s13, %s1402_s14  ;;  %s1476_s18 = smov [#allocation4]  }
 0x59a   : > { %s1406_s19 = sshll.u32 %s1476_s18, 4  ;;  %s1407_s19 = int_to_ptr.vmem [resolvable:$false] %s1406_s19 }
 0x59b   : > { %p1404_p2 = pnand %p1403_p1, %p1555_p5  ;;  %s1408_s0 = scalar_lea.vmem %s1407_s19, 32 }
 0x59c   : > { %p1409_p4 = scmp.lt.s32.totalorder %s1012_s13, %s1407_s19  ;;  %p1410_p7 = scmp.lt.s32.totalorder %s1408_s0, %s1402_s14 }
 0x59d   : > { %p1405_p3 = pneg %p1404_p2 }
 0x59e   : > { %p1411_p8 = por %p1410_p7, %p1409_p4 }
 0x5a0   : > { %p1412_p9 = pnand %p1411_p8, %p1405_p3 }
 0x5a2   : > { %1415 = shalt.err (!%p1412_p9)
}
 0x5a3   : > { %s1416_s21 = scalar_lea.hbm %s1795_s29, 16  ;;  %s1420_s9 = scalar_lea.hbm %s1852_s6, 32 }
 0x5a4   : > { %p1417_p10 = scmp.ne.s32.totalorder %s1795_s29, %s1416_s21  ;;  %p1421_p13 = scmp.lt.u32.totalorder %s1795_s29, %s1852_s6 }
 0x5a5   : > { %p1422_p0 = scmp.lt.u32.totalorder %s1420_s9, %s1416_s21  ;;  %p1424_p2 = scmp.lt.u32.totalorder %s1416_s21, %s1795_s29 }
 0x5a6   : > { %p1418_p11 = pnand %p1417_p10, %p1555_p5 }
 0x5a7   : > { %p1423_p1 = por %p1422_p0, %p1421_p13 }
 0x5a8   : > { %p1419_p12 = pneg %p1418_p11 }
 0x5a9   : > { %p1425_p3 = por %p1424_p2, %p1423_p1 }
 0x5ab   : > { %p1426_p4 = pnand %p1425_p3, %p1419_p12 }
 0x5ad   : > { %1429 = shalt.err (!%p1426_p4)
}
 0x5ae   : > { %1290 = dma.vmem_to_hbm [thread:$0]  (%p1555_p5), %s1012_s13, 16, %s1795_s29, %s979_s23   ;;  %v767_v7 = vshrl.u32 %v419_v27, 7  ;;  %vm813_vm12 = vcmask 0  }
 0x5af   : > { %p306_p5 = scmp.lt.s32.totalorder %s1538_s28, 1 }
 0x5b0   : > { %v768_v11 = vadd.s32 8, %v767_v7  ;;  %v769_v13 = vadd.s32 16, %v767_v7  ;;  %v771_v14 = vadd.s32 %v1723_v56, %v767_v7 }
 0x5b1   : > { %s1865_s28 = smov (!%p306_p5, %s1538_s28), 1 }
 0x5b2   : > { %v772_v12 = vadd.s32 %v1723_v56, %v768_v11  ;;  %v773_v15 = vadd.s32 %v1723_v56, %v769_v13  ;;  %vm774_vm10 = vcmp.lt.s32.totalorder %v771_v14, 40  ;;  %s308_s17 = scalar_lea.vmem %s1853_s7, %s1865_s28 }
 0x5b3   : > { %v1160_v17 = vsel %vm774_vm10, 1.0, %v1472_v6 }
 0x5b4   : > { %vm775_vm1 = vcmp.lt.s32.totalorder %v772_v12, 40  ;;  %vm776_vm11 = vcmp.lt.s32.totalorder %v773_v15, 40 }
 0x5b5   : > { %v1161_v16 = vsel %vm775_vm1, 1.0, %v1472_v6  ;;  %v1162_v3 = vsel %vm776_vm11, 1.0, %v1472_v6 }
 0x60e   : > { %v795_v18 = vpop.xlane.xlu1 %794 }
 0x60f   : > { %v802_v20 = vmul.f32 %v1160_v17, %v795_v18 }
 0x612   : > { %v798_v19 = vpop.xlane.xlu0 %797 }
 0x613   : > { %v803_v27 = vmul.f32 %v1161_v16, %v798_v19 }
 0x615   : > { %v805_v22 = vadd.f32 %v803_v27, %v802_v20 }
 0x616   : > { %v801_v21 = vpop.xlane.xlu1 %800 }
 0x617   : > { %v804_v23 = vmul.f32 %v1162_v3, %v801_v21 }
 0x619   : > { %v806_v24 = vadd.f32 %v805_v22, %v804_v23 }
 0x61b   : > { %v807_v25 = vrot.slane %v806_v24, 4 }
 0x61d   : > { %v808_v56 = vadd.f32 %v807_v25, %v806_v24 }
 0x61f   : > { %v809_v26 = vrot.slane %v808_v56, 2 }
 0x621   : > { %v810_v29 = vadd.f32 %v809_v26, %v808_v56 }
 0x623   : > { %v811_v30 = vrot.slane %v810_v29, 1 }
 0x625   : > { %v812_v31 = vadd.f32 %v811_v30, %v810_v29 }
 0x627   : > { %814 = vst.msk [vmem:[%s308_s17] sm:$0x1] %vm813_vm12, %v812_v31 }
 0x628 PF: > { %p1300_p7 = scmp.ge.s32.totalorder %s1468_s27, 2  ;;  %s1034_s20 = sand.u32 1, %s1456_s24  }
 0x629   : > { %s1035_s29 = scalar_lea.sflag [#allocation3], %s1034_s20 }
 0x62a   : > { %p1294_p8 = pnand %p1300_p7, %p1559_p6 }
 0x62c   : > { %1447 = dma.done.wait (!%p1294_p8), %s1035_s29, 16  }
 0x62d   : > { %1449 = vsyncadd (!%p1294_p8), %s1035_s29, 4294967280  ;;  %s1043_s13 = scalar_lea.sflag [#allocation5], %s1034_s20 }
 0x62e   : > { %1451 = dma.done.wait (!%p1294_p8), %s1043_s13, 16  }
 0x62f   : > { %1453 = vsyncadd (!%p1294_p8), %s1043_s13, 4294967280  ;;  %p21_p9 = scmp.ge.s32.totalorder %s1542_s30, 4   ;;  %s1858_s24 = smov %s1460_s25 }
 0x630   : > { %s1859_s25 = smov %s1464_s26  ;;  %s1860_s26 = smov %s1553_s10 }
 0x631   : > { %s1861_s27 = smov %s1542_s30  ;;  %23 = sbr.rel (!%p21_p9) target bundleno = 7 (0x7), region = 112 }
 0x638   :  { %1053 = vsyncpa [#allocation3], 1 }
 0x639   :  { %1055 = vsyncpa [#allocation3 + $0x1], 1 }
 0x63a   :  { %1056 = vsyncpa [#allocation5], 1 }
 0x63b   :  { %1058 = vsyncpa [#allocation5 + $0x1], 1 }

</bundles_post_ra>
